<compile_context>
chip_gen: v7x
topology: tpu7x:2x2x1
jax: 0.10.0
libtpu: 0.0.40
codegen_flags: <defaults>
</compile_context>

<pallas_src>
import math

import jax
import jax.numpy as jnp
from jax import lax
from jax.experimental import pallas as pl
from jax.experimental.pallas import tpu as pltpu

# ---- small stand-in sizes (module hard-codes 768 / 50265; scaled down) ------
B = 2              # batch
S = 16             # sequence length
H = 128            # hidden size      (stand-in for 768; lane aligned)
FF = 4 * H         # FFN width        (stand-in for 3072)
VOCAB = 512        # vocabulary size  (stand-in for 50265)
MAXPOS = 32        # position-embedding table size
VOCAB_TILE = 256   # lane-dense vocab N tile (use 1024-2048 bf16 at real scale)


# ----------------------------------------------------------------------------
# Fused kernel: [node->token masked averaging + blend] + [encoder layer]
#               + [vocab projection], one pallas_call, grid over vocab tiles.
# TODO(synk): self.bert is an external pretrained multi-layer multi-head
#             RoBERTa; replaced by a deterministic single-layer single-head
#             stand-in (embed+LN -> masked self-attn -> LN -> GELU FFN -> LN).
#             Token-type embeddings and dropout are omitted.
# ----------------------------------------------------------------------------
def _fused_kernel(posr_ref, posc_ref, attn_ref, emb_ref, posemb_ref,
                  wq_ref, wk_ref, wv_ref, wo_ref, w1_ref, w2_ref,
                  lng_ref, lnb_ref, outw_ref, outb_ref,
                  logits_ref, enc_ref):
    f32 = jnp.float32
    j = pl.program_id(0)

    # ---- encoder body: runs once, result stays VMEM-resident in enc_ref ----
    @pl.when(j == 0)
    def _():
        attn = attn_ref[...]                                  # (B,S,S) read once
        emb = emb_ref[...]                                    # (B,S,H)

        # node -> token masked averaging + blend (pure VPU mask, no diag matmul)
        token_row = (posr_ref[...] >= 2.0).astype(f32)        # (B,1,S)
        nodes_col = (posc_ref[...] == 0.0).astype(f32)        # (B,S,1)
        m = nodes_col * token_row * attn                      # (B,S,S)
        m = m / (jnp.sum(m, axis=-1, keepdims=True) + 1e-10)
        # non-node rows of m are zero, so avg*nodes_mask == avg
        x = emb * (1.0 - nodes_col) + jnp.einsum(
            'bqk,bkh->bqh', m, emb, preferred_element_type=f32)   # (B,S,H)

        # ---- stand-in encoder ----------------------------------------------
        ln_g = lng_ref[...]                                   # (3,H) loaded once
        ln_b = lnb_ref[...]

        def layer_norm(h, g, b):                              # one-pass variance
            mu = jnp.mean(h, axis=-1, keepdims=True)
            var = jnp.mean(h * h, axis=-1, keepdims=True) - mu * mu
            return (h - mu) * lax.rsqrt(var + 1e-5) * g + b

        # embeddings + LN; batch folded into the MXU M dimension (B*S rows)
        hf = (x + posemb_ref[...]).reshape(B * S, H)
        hf = layer_norm(hf, ln_g[0:1], ln_b[0:1])

        # single-head stand-in -> scale is 1/sqrt(H); folded into q here
        q = jnp.dot(hf, wq_ref[...], preferred_element_type=f32) * (
            1.0 / math.sqrt(H))
        k = jnp.dot(hf, wk_ref[...], preferred_element_type=f32)
        v = jnp.dot(hf, wv_ref[...], preferred_element_type=f32)

        # scores / softmax / PV stay per-batch
        q3 = q.reshape(B, S, H)
        k3 = k.reshape(B, S, H)
        v3 = v.reshape(B, S, H)
        scores = jnp.einsum('bqh,bkh->bqk', q3, k3, preferred_element_type=f32)
        scores = scores + (attn - 1.0) * 1e9                  # additive mask (f32)
        scores = scores - jnp.max(scores, axis=-1, keepdims=True)
        p = jnp.exp(scores)
        p = p * pl.reciprocal(jnp.sum(p, axis=-1, keepdims=True), approx=True)
        ao = jnp.einsum('bqk,bkh->bqh', p, v3,
                        preferred_element_type=f32).reshape(B * S, H)
        ao = jnp.dot(ao, wo_ref[...], preferred_element_type=f32)
        h1 = layer_norm(hf + ao, ln_g[1:2], ln_b[1:2])

        f = jnp.dot(h1, w1_ref[...], preferred_element_type=f32)
        f = jax.nn.gelu(f, approximate=True)
        f = jnp.dot(f, w2_ref[...], preferred_element_type=f32)
        enc_ref[...] = layer_norm(h1 + f, ln_g[2:3], ln_b[2:3])   # (B*S,H)

    # ---- per-tile vocab projection (self.linear_layer) ----------------------
    logits_ref[...] = (jnp.dot(enc_ref[...], outw_ref[...],
                               preferred_element_type=jnp.float32)
                       + outb_ref[...])


# ----------------------------------------------------------------------------
# Parameters (deterministic, synthetic)
# ----------------------------------------------------------------------------
def init_params(key):
    ks = jax.random.split(key, 10)
    s = 0.02
    return {
        "word_emb": jax.random.normal(ks[0], (VOCAB, H), jnp.float32) * s,
        "pos_emb": jax.random.normal(ks[1], (MAXPOS, H), jnp.float32) * s,
        "wq": jax.random.normal(ks[2], (H, H), jnp.float32) * s,
        "wk": jax.random.normal(ks[3], (H, H), jnp.float32) * s,
        "wv": jax.random.normal(ks[4], (H, H), jnp.float32) * s,
        "wo": jax.random.normal(ks[5], (H, H), jnp.float32) * s,
        "w1": jax.random.normal(ks[6], (H, FF), jnp.float32) * s,
        "w2": jax.random.normal(ks[7], (FF, H), jnp.float32) * s,
        "ln_g": jnp.ones((3, H), jnp.float32),
        "ln_b": jnp.zeros((3, H), jnp.float32),
        "out_w": jax.random.normal(ks[8], (H, VOCAB), jnp.float32) * s,
        "out_b": jax.random.normal(ks[9], (1, VOCAB), jnp.float32) * s,
    }


# ----------------------------------------------------------------------------
# Forward (mirrors Model.forward, code_inputs branch)
# ----------------------------------------------------------------------------
def model_forward(params, code_inputs, attn_mask, position_idx):
    # glue: embedding-table gathers + row/column forms of position_idx
    emb = jnp.take(params["word_emb"], code_inputs, axis=0)             # (B,S,H)
    posemb = jnp.take(params["pos_emb"], position_idx, axis=0)          # (B,S,H)
    pos_f = position_idx.astype(jnp.float32)
    pos_row = pos_f[:, None, :]                                         # (B,1,S)
    pos_col = pos_f[:, :, None]                                         # (B,S,1)

    n_tiles = VOCAB // VOCAB_TILE

    def full(shape):
        n = len(shape)
        return pl.BlockSpec(shape, lambda j, n=n: (0,) * n)

    logits2d = pl.pallas_call(
        _fused_kernel,
        out_shape=jax.ShapeDtypeStruct((B * S, VOCAB), jnp.float32),
        grid=(n_tiles,),
        in_specs=[
            full((B, 1, S)),                    # position ids (row form)
            full((B, S, 1)),                    # position ids (column form)
            full((B, S, S)),                    # attention mask
            full((B, S, H)),                    # word embeddings
            full((B, S, H)),                    # position embeddings
            full((H, H)), full((H, H)),         # wq, wk
            full((H, H)), full((H, H)),         # wv, wo
            full((H, FF)), full((FF, H)),       # w1, w2
            full((3, H)), full((3, H)),         # LN gamma / beta
            pl.BlockSpec((H, VOCAB_TILE), lambda j: (0, j)),   # vocab weight tile
            pl.BlockSpec((1, VOCAB_TILE), lambda j: (0, j)),   # vocab bias tile
        ],
        out_specs=pl.BlockSpec((B * S, VOCAB_TILE), lambda j: (0, j)),
        scratch_shapes=[pltpu.VMEM((B * S, H), jnp.float32)],  # resident encoder out
        compiler_params=pltpu.CompilerParams(
            # scratch written at j==0 is consumed by every later tile -> ordered
            dimension_semantics=("arbitrary",)),
    )(pos_row, pos_col, attn_mask, emb, posemb,
      params["wq"], params["wk"], params["wv"], params["wo"],
      params["w1"], params["w2"], params["ln_g"], params["ln_b"],
      params["out_w"], params["out_b"])

    return logits2d.reshape(B, S, VOCAB)


if __name__ == "__main__":
    key = jax.random.PRNGKey(0)
    kp, kc, ka = jax.random.split(key, 3)
    params = init_params(kp)

    code_inputs = jax.random.randint(kc, (B, S), 0, VOCAB, dtype=jnp.int32)
    # GraphCodeBERT convention: >=2 code tokens, 0 graph nodes, 1 padding.
    pos_row = jnp.concatenate([
        jnp.arange(2, 12, dtype=jnp.int32),     # 10 code tokens
        jnp.zeros((4,), jnp.int32),             # 4 graph nodes
        jnp.ones((2,), jnp.int32),              # 2 padding
    ])
    position_idx = jnp.tile(pos_row[None], (B, 1))
    attn_mask = (jax.random.uniform(ka, (B, S, S)) > 0.4).astype(jnp.float32)

    logits = model_forward(params, code_inputs, attn_mask, position_idx)
    jax.block_until_ready(logits)
    assert logits.shape == (B, S, VOCAB)
    assert bool(jnp.all(jnp.isfinite(logits)))
    print("KERNEL_OK")
</pallas_src>

<mosaic_0001>
module attributes {stable_mosaic.version = 11 : i64} {
  func.func @_fused_kernel(%arg0: i32, %arg1: memref<2x1x16xf32, #tpu.memory_space<vmem>>, %arg2: memref<2x16x1xf32, #tpu.memory_space<vmem>>, %arg3: memref<2x16x16xf32, #tpu.memory_space<vmem>>, %arg4: memref<2x16x128xf32, #tpu.memory_space<vmem>>, %arg5: memref<2x16x128xf32, #tpu.memory_space<vmem>>, %arg6: memref<128x128xf32, #tpu.memory_space<vmem>>, %arg7: memref<128x128xf32, #tpu.memory_space<vmem>>, %arg8: memref<128x128xf32, #tpu.memory_space<vmem>>, %arg9: memref<128x128xf32, #tpu.memory_space<vmem>>, %arg10: memref<128x512xf32, #tpu.memory_space<vmem>>, %arg11: memref<512x128xf32, #tpu.memory_space<vmem>>, %arg12: memref<3x128xf32, #tpu.memory_space<vmem>>, %arg13: memref<3x128xf32, #tpu.memory_space<vmem>>, %arg14: memref<128x256xf32, #tpu.memory_space<vmem>>, %arg15: memref<1x256xf32, #tpu.memory_space<vmem>>, %arg16: memref<32x256xf32, #tpu.memory_space<vmem>>, %arg17: memref<32x128xf32, #tpu.memory_space<vmem>>) attributes {dimension_semantics = [#tpu.dimension_semantics<arbitrary>], iteration_bounds = array<i64: 2>, scalar_prefetch = 0 : i64, scratch_operands = 1 : i64, tpu.core_type = #tpu.core_type<tc>, window_params = [{pipeline_mode = #tpu.pipeline_mode<synchronous>, transform_indices = @transform_0, window_bounds = array<i64: 2, 1, 16>}, {pipeline_mode = #tpu.pipeline_mode<synchronous>, transform_indices = @transform_1, window_bounds = array<i64: 2, 16, 1>}, {pipeline_mode = #tpu.pipeline_mode<synchronous>, transform_indices = @transform_2, window_bounds = array<i64: 2, 16, 16>}, {pipeline_mode = #tpu.pipeline_mode<synchronous>, transform_indices = @transform_3, window_bounds = array<i64: 2, 16, 128>}, {pipeline_mode = #tpu.pipeline_mode<synchronous>, transform_indices = @transform_4, window_bounds = array<i64: 2, 16, 128>}, {pipeline_mode = #tpu.pipeline_mode<synchronous>, transform_indices = @transform_5, window_bounds = array<i64: 128, 128>}, {pipeline_mode = #tpu.pipeline_mode<synchronous>, transform_indices = @transform_6, window_bounds = array<i64: 128, 128>}, {pipeline_mode = #tpu.pipeline_mode<synchronous>, transform_indices = @transform_7, window_bounds = array<i64: 128, 128>}, {pipeline_mode = #tpu.pipeline_mode<synchronous>, transform_indices = @transform_8, window_bounds = array<i64: 128, 128>}, {pipeline_mode = #tpu.pipeline_mode<synchronous>, transform_indices = @transform_9, window_bounds = array<i64: 128, 512>}, {pipeline_mode = #tpu.pipeline_mode<synchronous>, transform_indices = @transform_10, window_bounds = array<i64: 512, 128>}, {pipeline_mode = #tpu.pipeline_mode<synchronous>, transform_indices = @transform_11, window_bounds = array<i64: 3, 128>}, {pipeline_mode = #tpu.pipeline_mode<synchronous>, transform_indices = @transform_12, window_bounds = array<i64: 3, 128>}, {transform_indices = @transform_13, window_bounds = array<i64: 128, 256>}, {transform_indices = @transform_14, window_bounds = array<i64: 1, 256>}, {transform_indices = @transform_15, window_bounds = array<i64: 32, 256>}]} {
    %c0_i32 = arith.constant 0 : i32
    %0 = arith.cmpi eq, %arg0, %c0_i32 : i32
    %1 = arith.extui %0 : i1 to i32
    %c0_i32_0 = arith.constant 0 : i32
    %2 = arith.cmpi ne, %1, %c0_i32_0 : i32
    scf.if %2 {
      %c0_8 = arith.constant 0 : index
      %c0_9 = arith.constant 0 : index
      %c0_10 = arith.constant 0 : index
      %10 = vector.load %arg3[%c0_8, %c0_9, %c0_10] : memref<2x16x16xf32, #tpu.memory_space<vmem>>, vector<2x16x16xf32>
      %c0_11 = arith.constant 0 : index
      %c0_12 = arith.constant 0 : index
      %c0_13 = arith.constant 0 : index
      %11 = vector.load %arg4[%c0_11, %c0_12, %c0_13] : memref<2x16x128xf32, #tpu.memory_space<vmem>>, vector<2x16x128xf32>
      %c0_14 = arith.constant 0 : index
      %c0_15 = arith.constant 0 : index
      %c0_16 = arith.constant 0 : index
      %12 = vector.load %arg1[%c0_14, %c0_15, %c0_16] : memref<2x1x16xf32, #tpu.memory_space<vmem>>, vector<2x1x16xf32>
      %cst_17 = arith.constant 2.000000e+00 : f32
      %13 = vector.broadcast %cst_17 : f32 to vector<2x1x16xf32>
      %14 = arith.cmpf oge, %12, %13 : vector<2x1x16xf32>
      %15 = arith.extui %14 : vector<2x1x16xi1> to vector<2x1x16xi32>
      %16 = arith.sitofp %15 : vector<2x1x16xi32> to vector<2x1x16xf32>
      %c0_18 = arith.constant 0 : index
      %c0_19 = arith.constant 0 : index
      %c0_20 = arith.constant 0 : index
      %17 = vector.load %arg2[%c0_18, %c0_19, %c0_20] : memref<2x16x1xf32, #tpu.memory_space<vmem>>, vector<2x16x1xf32>
      %cst_21 = arith.constant 0.000000e+00 : f32
      %18 = vector.broadcast %cst_21 : f32 to vector<2x16x1xf32>
      %19 = arith.cmpf oeq, %17, %18 : vector<2x16x1xf32>
      %20 = arith.extui %19 : vector<2x16x1xi1> to vector<2x16x1xi32>
      %21 = arith.sitofp %20 : vector<2x16x1xi32> to vector<2x16x1xf32>
      %22 = vector.broadcast %21 : vector<2x16x1xf32> to vector<2x16x16xf32>
      %23 = vector.broadcast %16 : vector<2x1x16xf32> to vector<2x16x16xf32>
      %24 = arith.mulf %22, %23 : vector<2x16x16xf32>
      %25 = arith.mulf %24, %10 : vector<2x16x16xf32>
      %cst_22 = arith.constant dense<0.000000e+00> : vector<2x16xf32>
      %26 = vector.multi_reduction <add>, %25, %cst_22 [2] : vector<2x16x16xf32> to vector<2x16xf32>
      %27 = vector.shape_cast %26 : vector<2x16xf32> to vector<2x16x1xf32>
      %cst_23 = arith.constant 1.000000e-10 : f32
      %28 = vector.broadcast %cst_23 : f32 to vector<2x16x1xf32>
      %29 = arith.addf %27, %28 : vector<2x16x1xf32>
      %30 = vector.broadcast %29 : vector<2x16x1xf32> to vector<2x16x16xf32>
      %31 = arith.divf %25, %30 : vector<2x16x16xf32>
      %cst_24 = arith.constant 1.000000e+00 : f32
      %32 = vector.broadcast %cst_24 : f32 to vector<2x16x1xf32>
      %33 = arith.subf %32, %21 : vector<2x16x1xf32>
      %34 = vector.broadcast %33 : vector<2x16x1xf32> to vector<2x16x128xf32>
      %35 = arith.mulf %11, %34 : vector<2x16x128xf32>
      "tpu.trace_start"() <{level = 10 : i32, message = "bqk,bkh->bqh"}> : () -> ()
      %cst_25 = arith.constant dense<0.000000e+00> : vector<2x16x128xf32>
      %36 = tpu.matmul %31, %11, %cst_25 {dimension_numbers = #tpu.dot_dimension_numbers<[2], [1], [1], [2], [0, 0, 0, 1, 1, 2], [0], [0]>} : vector<2x16x16xf32>, vector<2x16x128xf32>, vector<2x16x128xf32> -> vector<2x16x128xf32>
      "tpu.trace_stop"() : () -> ()
      %37 = arith.addf %35, %36 : vector<2x16x128xf32>
      %c0_26 = arith.constant 0 : index
      %c0_27 = arith.constant 0 : index
      %38 = vector.load %arg12[%c0_26, %c0_27] : memref<3x128xf32, #tpu.memory_space<vmem>>, vector<3x128xf32>
      %c0_28 = arith.constant 0 : index
      %c0_29 = arith.constant 0 : index
      %39 = vector.load %arg13[%c0_28, %c0_29] : memref<3x128xf32, #tpu.memory_space<vmem>>, vector<3x128xf32>
      %c0_30 = arith.constant 0 : index
      %c0_31 = arith.constant 0 : index
      %c0_32 = arith.constant 0 : index
      %40 = vector.load %arg5[%c0_30, %c0_31, %c0_32] : memref<2x16x128xf32, #tpu.memory_space<vmem>>, vector<2x16x128xf32>
      %41 = arith.addf %37, %40 : vector<2x16x128xf32>
      %42 = vector.shape_cast %41 : vector<2x16x128xf32> to vector<32x128xf32>
      %43 = vector.extract_strided_slice %38 {offsets = [0, 0], sizes = [1, 128], strides = [1, 1]} : vector<3x128xf32> to vector<1x128xf32>
      %44 = vector.extract_strided_slice %39 {offsets = [0, 0], sizes = [1, 128], strides = [1, 1]} : vector<3x128xf32> to vector<1x128xf32>
      %cst_33 = arith.constant dense<0.000000e+00> : vector<32xf32>
      %45 = vector.multi_reduction <add>, %42, %cst_33 [1] : vector<32x128xf32> to vector<32xf32>
      %46 = vector.shape_cast %45 : vector<32xf32> to vector<32x1xf32>
      %cst_34 = arith.constant 1.280000e+02 : f32
      %47 = vector.broadcast %cst_34 : f32 to vector<32x1xf32>
      %48 = arith.divf %46, %47 : vector<32x1xf32>
      %49 = arith.mulf %42, %42 : vector<32x128xf32>
      %cst_35 = arith.constant dense<0.000000e+00> : vector<32xf32>
      %50 = vector.multi_reduction <add>, %49, %cst_35 [1] : vector<32x128xf32> to vector<32xf32>
      %51 = vector.shape_cast %50 : vector<32xf32> to vector<32x1xf32>
      %cst_36 = arith.constant 1.280000e+02 : f32
      %52 = vector.broadcast %cst_36 : f32 to vector<32x1xf32>
      %53 = arith.divf %51, %52 : vector<32x1xf32>
      %54 = arith.mulf %48, %48 : vector<32x1xf32>
      %55 = arith.subf %53, %54 : vector<32x1xf32>
      %56 = vector.broadcast %48 : vector<32x1xf32> to vector<32x128xf32>
      %57 = arith.subf %42, %56 : vector<32x128xf32>
      %cst_37 = arith.constant 9.99999974E-6 : f32
      %58 = vector.broadcast %cst_37 : f32 to vector<32x1xf32>
      %59 = arith.addf %55, %58 : vector<32x1xf32>
      %60 = math.rsqrt %59 : vector<32x1xf32>
      %61 = vector.broadcast %60 : vector<32x1xf32> to vector<32x128xf32>
      %62 = arith.mulf %57, %61 : vector<32x128xf32>
      %63 = vector.broadcast %43 : vector<1x128xf32> to vector<32x128xf32>
      %64 = arith.mulf %62, %63 : vector<32x128xf32>
      %65 = vector.broadcast %44 : vector<1x128xf32> to vector<32x128xf32>
      %66 = arith.addf %64, %65 : vector<32x128xf32>
      %c0_38 = arith.constant 0 : index
      %c0_39 = arith.constant 0 : index
      %67 = vector.load %arg6[%c0_38, %c0_39] : memref<128x128xf32, #tpu.memory_space<vmem>>, vector<128x128xf32>
      %cst_40 = arith.constant dense<0.000000e+00> : vector<32x128xf32>
      %68 = tpu.matmul %66, %67, %cst_40 {dimension_numbers = #tpu.dot_dimension_numbers<[1], [0], [0], [1], [0, 0, 1, 1], [], []>} : vector<32x128xf32>, vector<128x128xf32>, vector<32x128xf32> -> vector<32x128xf32>
      %cst_41 = arith.constant 0.0883883461 : f32
      %69 = vector.broadcast %cst_41 : f32 to vector<32x128xf32>
      %70 = arith.mulf %68, %69 : vector<32x128xf32>
      %c0_42 = arith.constant 0 : index
      %c0_43 = arith.constant 0 : index
      %71 = vector.load %arg7[%c0_42, %c0_43] : memref<128x128xf32, #tpu.memory_space<vmem>>, vector<128x128xf32>
      %cst_44 = arith.constant dense<0.000000e+00> : vector<32x128xf32>
      %72 = tpu.matmul %66, %71, %cst_44 {dimension_numbers = #tpu.dot_dimension_numbers<[1], [0], [0], [1], [0, 0, 1, 1], [], []>} : vector<32x128xf32>, vector<128x128xf32>, vector<32x128xf32> -> vector<32x128xf32>
      %c0_45 = arith.constant 0 : index
      %c0_46 = arith.constant 0 : index
      %73 = vector.load %arg8[%c0_45, %c0_46] : memref<128x128xf32, #tpu.memory_space<vmem>>, vector<128x128xf32>
      %cst_47 = arith.constant dense<0.000000e+00> : vector<32x128xf32>
      %74 = tpu.matmul %66, %73, %cst_47 {dimension_numbers = #tpu.dot_dimension_numbers<[1], [0], [0], [1], [0, 0, 1, 1], [], []>} : vector<32x128xf32>, vector<128x128xf32>, vector<32x128xf32> -> vector<32x128xf32>
      %75 = vector.shape_cast %70 : vector<32x128xf32> to vector<2x16x128xf32>
      %76 = vector.shape_cast %72 : vector<32x128xf32> to vector<2x16x128xf32>
      %77 = vector.shape_cast %74 : vector<32x128xf32> to vector<2x16x128xf32>
      "tpu.trace_start"() <{level = 10 : i32, message = "bqh,bkh->bqk"}> : () -> ()
      %cst_48 = arith.constant dense<0.000000e+00> : vector<2x16x16xf32>
      %78 = tpu.matmul %75, %76, %cst_48 {dimension_numbers = #tpu.dot_dimension_numbers<[2], [2], [1], [1], [0, 0, 0, 1, 1, 1], [0], [0]>} : vector<2x16x128xf32>, vector<2x16x128xf32>, vector<2x16x16xf32> -> vector<2x16x16xf32>
      "tpu.trace_stop"() : () -> ()
      %cst_49 = arith.constant 1.000000e+00 : f32
      %79 = vector.broadcast %cst_49 : f32 to vector<2x16x16xf32>
      %80 = arith.subf %10, %79 : vector<2x16x16xf32>
      %cst_50 = arith.constant 1.000000e+09 : f32
      %81 = vector.broadcast %cst_50 : f32 to vector<2x16x16xf32>
      %82 = arith.mulf %80, %81 : vector<2x16x16xf32>
      %83 = arith.addf %78, %82 : vector<2x16x16xf32>
      %cst_51 = arith.constant dense<0xFF800000> : vector<2x16xf32>
      %84 = vector.multi_reduction <maximumf>, %83, %cst_51 [2] : vector<2x16x16xf32> to vector<2x16xf32>
      %85 = vector.shape_cast %84 : vector<2x16xf32> to vector<2x16x1xf32>
      %86 = vector.broadcast %85 : vector<2x16x1xf32> to vector<2x16x16xf32>
      %87 = arith.subf %83, %86 : vector<2x16x16xf32>
      %88 = math.exp %87 : vector<2x16x16xf32>
      %cst_52 = arith.constant dense<0.000000e+00> : vector<2x16xf32>
      %89 = vector.multi_reduction <add>, %88, %cst_52 [2] : vector<2x16x16xf32> to vector<2x16xf32>
      %90 = vector.shape_cast %89 : vector<2x16xf32> to vector<2x16x1xf32>
      %91 = tpu.reciprocal %90 {approx = true} : vector<2x16x1xf32> -> vector<2x16x1xf32>
      %92 = vector.broadcast %91 : vector<2x16x1xf32> to vector<2x16x16xf32>
      %93 = arith.mulf %88, %92 : vector<2x16x16xf32>
      "tpu.trace_start"() <{level = 10 : i32, message = "bqk,bkh->bqh"}> : () -> ()
      %cst_53 = arith.constant dense<0.000000e+00> : vector<2x16x128xf32>
      %94 = tpu.matmul %93, %77, %cst_53 {dimension_numbers = #tpu.dot_dimension_numbers<[2], [1], [1], [2], [0, 0, 0, 1, 1, 2], [0], [0]>} : vector<2x16x16xf32>, vector<2x16x128xf32>, vector<2x16x128xf32> -> vector<2x16x128xf32>
      "tpu.trace_stop"() : () -> ()
      %95 = vector.shape_cast %94 : vector<2x16x128xf32> to vector<32x128xf32>
      %c0_54 = arith.constant 0 : index
      %c0_55 = arith.constant 0 : index
      %96 = vector.load %arg9[%c0_54, %c0_55] : memref<128x128xf32, #tpu.memory_space<vmem>>, vector<128x128xf32>
      %cst_56 = arith.constant dense<0.000000e+00> : vector<32x128xf32>
      %97 = tpu.matmul %95, %96, %cst_56 {dimension_numbers = #tpu.dot_dimension_numbers<[1], [0], [0], [1], [0, 0, 1, 1], [], []>} : vector<32x128xf32>, vector<128x128xf32>, vector<32x128xf32> -> vector<32x128xf32>
      %98 = arith.addf %66, %97 : vector<32x128xf32>
      %99 = vector.extract_strided_slice %38 {offsets = [1, 0], sizes = [1, 128], strides = [1, 1]} : vector<3x128xf32> to vector<1x128xf32>
      %100 = vector.extract_strided_slice %39 {offsets = [1, 0], sizes = [1, 128], strides = [1, 1]} : vector<3x128xf32> to vector<1x128xf32>
      %cst_57 = arith.constant dense<0.000000e+00> : vector<32xf32>
      %101 = vector.multi_reduction <add>, %98, %cst_57 [1] : vector<32x128xf32> to vector<32xf32>
      %102 = vector.shape_cast %101 : vector<32xf32> to vector<32x1xf32>
      %cst_58 = arith.constant 1.280000e+02 : f32
      %103 = vector.broadcast %cst_58 : f32 to vector<32x1xf32>
      %104 = arith.divf %102, %103 : vector<32x1xf32>
      %105 = arith.mulf %98, %98 : vector<32x128xf32>
      %cst_59 = arith.constant dense<0.000000e+00> : vector<32xf32>
      %106 = vector.multi_reduction <add>, %105, %cst_59 [1] : vector<32x128xf32> to vector<32xf32>
      %107 = vector.shape_cast %106 : vector<32xf32> to vector<32x1xf32>
      %cst_60 = arith.constant 1.280000e+02 : f32
      %108 = vector.broadcast %cst_60 : f32 to vector<32x1xf32>
      %109 = arith.divf %107, %108 : vector<32x1xf32>
      %110 = arith.mulf %104, %104 : vector<32x1xf32>
      %111 = arith.subf %109, %110 : vector<32x1xf32>
      %112 = vector.broadcast %104 : vector<32x1xf32> to vector<32x128xf32>
      %113 = arith.subf %98, %112 : vector<32x128xf32>
      %cst_61 = arith.constant 9.99999974E-6 : f32
      %114 = vector.broadcast %cst_61 : f32 to vector<32x1xf32>
      %115 = arith.addf %111, %114 : vector<32x1xf32>
      %116 = math.rsqrt %115 : vector<32x1xf32>
      %117 = vector.broadcast %116 : vector<32x1xf32> to vector<32x128xf32>
      %118 = arith.mulf %113, %117 : vector<32x128xf32>
      %119 = vector.broadcast %99 : vector<1x128xf32> to vector<32x128xf32>
      %120 = arith.mulf %118, %119 : vector<32x128xf32>
      %121 = vector.broadcast %100 : vector<1x128xf32> to vector<32x128xf32>
      %122 = arith.addf %120, %121 : vector<32x128xf32>
      %c0_62 = arith.constant 0 : index
      %c0_63 = arith.constant 0 : index
      %123 = vector.load %arg10[%c0_62, %c0_63] : memref<128x512xf32, #tpu.memory_space<vmem>>, vector<128x512xf32>
      %cst_64 = arith.constant dense<0.000000e+00> : vector<32x512xf32>
      %124 = tpu.matmul %122, %123, %cst_64 {dimension_numbers = #tpu.dot_dimension_numbers<[1], [0], [0], [1], [0, 0, 1, 1], [], []>} : vector<32x128xf32>, vector<128x512xf32>, vector<32x512xf32> -> vector<32x512xf32>
      %125 = arith.mulf %124, %124 : vector<32x512xf32>
      %126 = arith.mulf %124, %125 : vector<32x512xf32>
      %cst_65 = arith.constant 4.471500e-02 : f32
      %127 = vector.broadcast %cst_65 : f32 to vector<32x512xf32>
      %128 = arith.mulf %127, %126 : vector<32x512xf32>
      %129 = arith.addf %124, %128 : vector<32x512xf32>
      %cst_66 = arith.constant 0.797884583 : f32
      %130 = vector.broadcast %cst_66 : f32 to vector<32x512xf32>
      %131 = arith.mulf %130, %129 : vector<32x512xf32>
      %132 = math.tanh %131 : vector<32x512xf32>
      %cst_67 = arith.constant 1.000000e+00 : f32
      %133 = vector.broadcast %cst_67 : f32 to vector<32x512xf32>
      %134 = arith.addf %133, %132 : vector<32x512xf32>
      %cst_68 = arith.constant 5.000000e-01 : f32
      %135 = vector.broadcast %cst_68 : f32 to vector<32x512xf32>
      %136 = arith.mulf %135, %134 : vector<32x512xf32>
      %137 = arith.mulf %124, %136 : vector<32x512xf32>
      %c0_69 = arith.constant 0 : index
      %c0_70 = arith.constant 0 : index
      %138 = vector.load %arg11[%c0_69, %c0_70] : memref<512x128xf32, #tpu.memory_space<vmem>>, vector<512x128xf32>
      %cst_71 = arith.constant dense<0.000000e+00> : vector<32x128xf32>
      %139 = tpu.matmul %137, %138, %cst_71 {dimension_numbers = #tpu.dot_dimension_numbers<[1], [0], [0], [1], [0, 0, 1, 1], [], []>} : vector<32x512xf32>, vector<512x128xf32>, vector<32x128xf32> -> vector<32x128xf32>
      %140 = arith.addf %122, %139 : vector<32x128xf32>
      %141 = vector.extract_strided_slice %38 {offsets = [2, 0], sizes = [1, 128], strides = [1, 1]} : vector<3x128xf32> to vector<1x128xf32>
      %142 = vector.extract_strided_slice %39 {offsets = [2, 0], sizes = [1, 128], strides = [1, 1]} : vector<3x128xf32> to vector<1x128xf32>
      %cst_72 = arith.constant dense<0.000000e+00> : vector<32xf32>
      %143 = vector.multi_reduction <add>, %140, %cst_72 [1] : vector<32x128xf32> to vector<32xf32>
      %144 = vector.shape_cast %143 : vector<32xf32> to vector<32x1xf32>
      %cst_73 = arith.constant 1.280000e+02 : f32
      %145 = vector.broadcast %cst_73 : f32 to vector<32x1xf32>
      %146 = arith.divf %144, %145 : vector<32x1xf32>
      %147 = arith.mulf %140, %140 : vector<32x128xf32>
      %cst_74 = arith.constant dense<0.000000e+00> : vector<32xf32>
      %148 = vector.multi_reduction <add>, %147, %cst_74 [1] : vector<32x128xf32> to vector<32xf32>
      %149 = vector.shape_cast %148 : vector<32xf32> to vector<32x1xf32>
      %cst_75 = arith.constant 1.280000e+02 : f32
      %150 = vector.broadcast %cst_75 : f32 to vector<32x1xf32>
      %151 = arith.divf %149, %150 : vector<32x1xf32>
      %152 = arith.mulf %146, %146 : vector<32x1xf32>
      %153 = arith.subf %151, %152 : vector<32x1xf32>
      %154 = vector.broadcast %146 : vector<32x1xf32> to vector<32x128xf32>
      %155 = arith.subf %140, %154 : vector<32x128xf32>
      %cst_76 = arith.constant 9.99999974E-6 : f32
      %156 = vector.broadcast %cst_76 : f32 to vector<32x1xf32>
      %157 = arith.addf %153, %156 : vector<32x1xf32>
      %158 = math.rsqrt %157 : vector<32x1xf32>
      %159 = vector.broadcast %158 : vector<32x1xf32> to vector<32x128xf32>
      %160 = arith.mulf %155, %159 : vector<32x128xf32>
      %161 = vector.broadcast %141 : vector<1x128xf32> to vector<32x128xf32>
      %162 = arith.mulf %160, %161 : vector<32x128xf32>
      %163 = vector.broadcast %142 : vector<1x128xf32> to vector<32x128xf32>
      %164 = arith.addf %162, %163 : vector<32x128xf32>
      %c0_77 = arith.constant 0 : index
      %c0_78 = arith.constant 0 : index
      %165 = vector.load %arg17[%c0_77, %c0_78] : memref<32x128xf32, #tpu.memory_space<vmem>>, vector<32x128xf32>
      tpu.vector_store %arg17[%c0_77, %c0_78], %164 {strides = array<i32>} : memref<32x128xf32, #tpu.memory_space<vmem>>, vector<32x128xf32>,
    } else {
    }
    %c0 = arith.constant 0 : index
    %c0_1 = arith.constant 0 : index
    %3 = vector.load %arg17[%c0, %c0_1] : memref<32x128xf32, #tpu.memory_space<vmem>>, vector<32x128xf32>
    %c0_2 = arith.constant 0 : index
    %c0_3 = arith.constant 0 : index
    %4 = vector.load %arg14[%c0_2, %c0_3] : memref<128x256xf32, #tpu.memory_space<vmem>>, vector<128x256xf32>
    %cst = arith.constant dense<0.000000e+00> : vector<32x256xf32>
    %5 = tpu.matmul %3, %4, %cst {dimension_numbers = #tpu.dot_dimension_numbers<[1], [0], [0], [1], [0, 0, 1, 1], [], []>} : vector<32x128xf32>, vector<128x256xf32>, vector<32x256xf32> -> vector<32x256xf32>
    %c0_4 = arith.constant 0 : index
    %c0_5 = arith.constant 0 : index
    %6 = vector.load %arg15[%c0_4, %c0_5] : memref<1x256xf32, #tpu.memory_space<vmem>>, vector<1x256xf32>
    %7 = vector.broadcast %6 : vector<1x256xf32> to vector<32x256xf32>
    %8 = arith.addf %5, %7 : vector<32x256xf32>
    %c0_6 = arith.constant 0 : index
    %c0_7 = arith.constant 0 : index
    %9 = vector.load %arg16[%c0_6, %c0_7] : memref<32x256xf32, #tpu.memory_space<vmem>>, vector<32x256xf32>
    tpu.vector_store %arg16[%c0_6, %c0_7], %8 {strides = array<i32>} : memref<32x256xf32, #tpu.memory_space<vmem>>, vector<32x256xf32>,
    return
  }
  func.func @transform_0(%arg0: i32) -> (i32, i32, i32) {
    %c0_i32 = arith.constant 0 : i32
    %c0_i32_0 = arith.constant 0 : i32
    %c0_i32_1 = arith.constant 0 : i32
    %c0_i32_2 = arith.constant 0 : i32
    return %c0_i32, %c0_i32_0, %c0_i32_1 : i32, i32, i32
  }
  func.func @transform_1(%arg0: i32) -> (i32, i32, i32) {
    %c0_i32 = arith.constant 0 : i32
    %c0_i32_0 = arith.constant 0 : i32
    %c0_i32_1 = arith.constant 0 : i32
    %c0_i32_2 = arith.constant 0 : i32
    return %c0_i32, %c0_i32_0, %c0_i32_1 : i32, i32, i32
  }
  func.func @transform_2(%arg0: i32) -> (i32, i32, i32) {
    %c0_i32 = arith.constant 0 : i32
    %c0_i32_0 = arith.constant 0 : i32
    %c0_i32_1 = arith.constant 0 : i32
    %c0_i32_2 = arith.constant 0 : i32
    return %c0_i32, %c0_i32_0, %c0_i32_1 : i32, i32, i32
  }
  func.func @transform_3(%arg0: i32) -> (i32, i32, i32) {
    %c0_i32 = arith.constant 0 : i32
    %c0_i32_0 = arith.constant 0 : i32
    %c0_i32_1 = arith.constant 0 : i32
    %c0_i32_2 = arith.constant 0 : i32
    return %c0_i32, %c0_i32_0, %c0_i32_1 : i32, i32, i32
  }
  func.func @transform_4(%arg0: i32) -> (i32, i32, i32) {
    %c0_i32 = arith.constant 0 : i32
    %c0_i32_0 = arith.constant 0 : i32
    %c0_i32_1 = arith.constant 0 : i32
    %c0_i32_2 = arith.constant 0 : i32
    return %c0_i32, %c0_i32_0, %c0_i32_1 : i32, i32, i32
  }
  func.func @transform_5(%arg0: i32) -> (i32, i32) {
    %c0_i32 = arith.constant 0 : i32
    %c0_i32_0 = arith.constant 0 : i32
    %c0_i32_1 = arith.constant 0 : i32
    return %c0_i32, %c0_i32_0 : i32, i32
  }
  func.func @transform_6(%arg0: i32) -> (i32, i32) {
    %c0_i32 = arith.constant 0 : i32
    %c0_i32_0 = arith.constant 0 : i32
    %c0_i32_1 = arith.constant 0 : i32
    return %c0_i32, %c0_i32_0 : i32, i32
  }
  func.func @transform_7(%arg0: i32) -> (i32, i32) {
    %c0_i32 = arith.constant 0 : i32
    %c0_i32_0 = arith.constant 0 : i32
    %c0_i32_1 = arith.constant 0 : i32
    return %c0_i32, %c0_i32_0 : i32, i32
  }
  func.func @transform_8(%arg0: i32) -> (i32, i32) {
    %c0_i32 = arith.constant 0 : i32
    %c0_i32_0 = arith.constant 0 : i32
    %c0_i32_1 = arith.constant 0 : i32
    return %c0_i32, %c0_i32_0 : i32, i32
  }
  func.func @transform_9(%arg0: i32) -> (i32, i32) {
    %c0_i32 = arith.constant 0 : i32
    %c0_i32_0 = arith.constant 0 : i32
    %c0_i32_1 = arith.constant 0 : i32
    return %c0_i32, %c0_i32_0 : i32, i32
  }
  func.func @transform_10(%arg0: i32) -> (i32, i32) {
    %c0_i32 = arith.constant 0 : i32
    %c0_i32_0 = arith.constant 0 : i32
    %c0_i32_1 = arith.constant 0 : i32
    return %c0_i32, %c0_i32_0 : i32, i32
  }
  func.func @transform_11(%arg0: i32) -> (i32, i32) {
    %c0_i32 = arith.constant 0 : i32
    %c0_i32_0 = arith.constant 0 : i32
    %c0_i32_1 = arith.constant 0 : i32
    return %c0_i32, %c0_i32_0 : i32, i32
  }
  func.func @transform_12(%arg0: i32) -> (i32, i32) {
    %c0_i32 = arith.constant 0 : i32
    %c0_i32_0 = arith.constant 0 : i32
    %c0_i32_1 = arith.constant 0 : i32
    return %c0_i32, %c0_i32_0 : i32, i32
  }
  func.func @transform_13(%arg0: i32) -> (i32, i32) {
    %c0_i32 = arith.constant 0 : i32
    %c0_i32_0 = arith.constant 0 : i32
    return %c0_i32, %arg0 : i32, i32
  }
  func.func @transform_14(%arg0: i32) -> (i32, i32) {
    %c0_i32 = arith.constant 0 : i32
    %c0_i32_0 = arith.constant 0 : i32
    return %c0_i32, %arg0 : i32, i32
  }
  func.func @transform_15(%arg0: i32) -> (i32, i32) {
    %c0_i32 = arith.constant 0 : i32
    %c0_i32_0 = arith.constant 0 : i32
    return %c0_i32, %arg0 : i32, i32
  }
}

</mosaic_0001>

<bundles_post_ra>
// kernel: tpu_custom_call.1
= control target key start
LH: loop header
LB: loop body
LE: loop exit
PB: predicated region body
PF: predicated region fallthrough
CT: control target
= control target key end

     0   :  { %s5198_s0 = inlined_call_operand.hbm [shape: f32[2,1,16], index: 0, kind: input, shape index: {}]   ;;  %s5199_s1 = inlined_call_operand.vmem [shape: f32[2,16,1], index: 1, kind: input, shape index: {}]   ;;  %s5200_s2 = inlined_call_operand.vmem [shape: f32[2,16,16], index: 2, kind: input, shape index: {}]   ;;  %s5201_s3 = inlined_call_operand.hbm [shape: f32[2,16,128], index: 3, kind: input, shape index: {}]   ;;  %s5202_s4 = inlined_call_operand.hbm [shape: f32[2,16,128], index: 4, kind: input, shape index: {}]   ;;  %s5203_s5 = inlined_call_operand.hbm [shape: f32[128,128], index: 5, kind: input, shape index: {}]   ;;  %s5204_s6 = inlined_call_operand.hbm [shape: f32[128,128], index: 6, kind: input, shape index: {}]   ;;  %s5205_s7 = inlined_call_operand.hbm [shape: f32[128,128], index: 7, kind: input, shape index: {}]   ;;  %s5206_s8 = inlined_call_operand.hbm [shape: f32[128,128], index: 8, kind: input, shape index: {}]   ;;  %s5207_s9 = inlined_call_operand.hbm [shape: f32[128,512], index: 9, kind: input, shape index: {}]   ;;  %s5208_s10 = inlined_call_operand.hbm [shape: f32[512,128], index: 10, kind: input, shape index: {}]   ;;  %s5209_s11 = inlined_call_operand.vmem [shape: f32[3,128], index: 11, kind: input, shape index: {}]   ;;  %s5210_s12 = inlined_call_operand.vmem [shape: f32[3,128], index: 12, kind: input, shape index: {}]   ;;  %s5211_s13 = inlined_call_operand.hbm [shape: f32[128,512], index: 13, kind: input, shape index: {}]   ;;  %s5212_s14 = inlined_call_operand.vmem [shape: f32[1,512], index: 14, kind: input, shape index: {}]   ;;  %s5213_s15 = inlined_call_operand.hbm [shape: f32[32,512], index: 15, kind: output, shape index: {}]  }
   0x1   :  { %5228 = sst [smem:[#allocation29_spill]] %s5198_s0 }
   0x2   :  { %5229 = sst [smem:[#allocation30_spill]] %s5199_s1 }
   0x3   :  { %5230 = sst [smem:[#allocation31_spill]] %s5200_s2 }
   0x4   :  { %5231 = sst [smem:[#allocation32_spill]] %s5201_s3 }
   0x5   :  { %5232 = sst [smem:[#allocation33_spill]] %s5202_s4 }
   0x6   :  { %5233 = sst [smem:[#allocation34_spill]] %s5203_s5 }
   0x7   :  { %5234 = sst [smem:[#allocation35_spill]] %s5209_s11 }
   0x8   :  { %5235 = sst [smem:[#allocation36_spill]] %s5210_s12 }
   0x9   :  { %5236 = sst [smem:[#allocation37_spill]] %s5212_s14 }
   0xa   :  { %5237 = sst [smem:[#allocation38_spill]] %s5213_s15 }
   0xb   :  { %20 = vsyncpa [#allocation4], 0 }
   0xc   :  { %21 = vsyncpa [#allocation7], 0 }
   0xd   :  { %22 = vsyncpa [#allocation10], 0 }
   0xe   :  { %23 = vsyncpa [#allocation13], 0 }
   0xf   :  { %24 = vsyncpa [#allocation16], 0 }
  0x10   :  { %25 = vsyncpa [#allocation19], 0 }
  0x11   :  { %27 = vsyncpa [#allocation19 + $0x1], 0 }
  0x12   :  { %28 = vsyncpa [#allocation5], 0 }
  0x13   :  { %30 = vsyncpa [#allocation5 + $0x1], 0  ;;  %s4394_s18 = smov 0   ;;  %s4396_s19 = smov 0  }
  0x14   :  { %s4398_s20 = smov 0   ;;  %s4400_s21 = smov 0  }
  0x15 LB: > { %s4290_s22 = smov [#allocation6]   ;;  %s4415_s24 = sadd.s32 4294967295, %s4288_s21   ;;  %s4288_s21 = sphi %s4400_s21, %s5281_s21   ;;  %s4284_s20 = sphi %s4398_s20, %s5280_s20   ;;  %s4280_s19 = sphi %s4396_s19, %s5279_s19   ;;  %s4276_s18 = sphi %s4394_s18, %s5278_s18  }
  0x16   : > { %s423_s23 = sshll.u32 %s4290_s22, 4  ;;  %p2909_p0 = scmp.ge.s32.totalorder %s4288_s21, 1  ;;  %s4421_s23 = int_to_ptr.vmem [resolvable:$true] %s423_s23 }
  0x17   : > { %p5220_p1 = scmp.eq.s32.totalorder %s4415_s24, 0  ;;  %p392_p2 = scmp.lt.s32.totalorder %s4288_s21, 3 }
  0x18   : > { %s4291_s26 = smov [#allocation9]   ;;  %s4292_s29 = smov [#allocation12]  }
  0x19   : > { %p4423_p4 = pnand %p2909_p0, %p392_p2  ;;  %s449_s27 = sshll.u32 %s4291_s26, 4  ;;  %s4436_s27 = int_to_ptr.vmem [resolvable:$true] %s449_s27 }
  0x1a   : > { %s475_s30 = sshll.u32 %s4292_s29, 4  ;;  %s5241_s3 = sld [smem:[#allocation32_spill]]  ;;  %s4438_s30 = int_to_ptr.vmem [resolvable:$true] %s475_s30 }
  0x1b   : > { %s5238_s25 = scalar_select %p4423_p4, 1, 0 }
  0x1c   : > { %p3716_p6 = pneg %p4423_p4 }
  0x1d   : > { %5239 = sst [smem:[#allocation28_spill]] %s5238_s25 }
  0x1e   : > { %p4432_p7 = pnand %p3716_p6, %p5220_p1 }
  0x20   : > { %s3920_s22 = scalar_lea.hbm %s5241_s3, 512  ;;  %p4448_p9 = pneg %p4432_p7 }
  0x21   : > { %p3921_p8 = scmp.ne.s32.totalorder %s5241_s3, %s3920_s22  ;;  %p3927_p12 = scmp.lt.u32.totalorder %s3920_s22, %s5241_s3 }
  0x23   : > { %p3923_p10 = pnand %p4448_p9, %p3921_p8 }
  0x25   : > { %p3924_p11 = pneg %p3923_p10 }
  0x27   : > { %p3929_p13 = pnand %p3927_p12, %p3924_p11 }
  0x29   : > { %3932 = shalt.err (!%p3929_p13)
}
  0x2a   : > { %s3933_s12 = scalar_lea.vmem %s4421_s23, 512  ;;  %p3941_p5 = scmp.lt.s32.totalorder %s4421_s23, %s4421_s23 }
  0x2b   : > { %p3934_p0 = scmp.ne.s32.totalorder %s4421_s23, %s3933_s12  ;;  %p3942_p3 = scmp.lt.s32.totalorder %s3933_s12, %s3933_s12 }
  0x2d   : > { %p3936_p2 = pnand %p3934_p0, %p4448_p9  ;;  %p3943_p8 = por %p3942_p3, %p3941_p5 }
  0x2f   : > { %p3937_p6 = pneg %p3936_p2 }
  0x31   : > { %p3944_p10 = pnand %p3943_p8, %p3937_p6 }
  0x33   : > { %3947 = shalt.err (!%p3944_p10)
}
  0x34   : > { %s5222_s15 = smov 128   ;;  %s5224_s11 = smov 8  }
  0x35   : > { %3722 = dma.hbm_to_vmem [thread:$0]  (!%p4432_p7), %s5241_s3, 512, %s4421_s23, [#allocation7], %s5222_s15, %s5222_s15, %s5224_s11  }
  0x36   : > { %s5243_s5 = sld [smem:[#allocation34_spill]] }
  0x3c   : > { %s3948_s12 = scalar_lea.hbm %s5243_s5, 2048 }
  0x3d   : > { %p3949_p3 = scmp.ne.s32.totalorder %s5243_s5, %s3948_s12  ;;  %p3955_p12 = scmp.lt.u32.totalorder %s3948_s12, %s5243_s5 }
  0x3f   : > { %p3951_p5 = pnand %p3949_p3, %p4448_p9 }
  0x41   : > { %p3952_p11 = pneg %p3951_p5 }
  0x43   : > { %p3957_p13 = pnand %p3955_p12, %p3952_p11 }
  0x45   : > { %3960 = shalt.err (!%p3957_p13)
}
  0x46   : > { %s3961_s23 = scalar_lea.vmem %s4436_s27, 2048  ;;  %p3969_p8 = scmp.lt.s32.totalorder %s4436_s27, %s4436_s27 }
  0x47   : > { %p3962_p0 = scmp.ne.s32.totalorder %s4436_s27, %s3961_s23  ;;  %p3970_p10 = scmp.lt.s32.totalorder %s3961_s23, %s3961_s23 }
  0x49   : > { %p3964_p2 = pnand %p3962_p0, %p4448_p9  ;;  %p3971_p3 = por %p3970_p10, %p3969_p8 }
  0x4b   : > { %p3965_p6 = pneg %p3964_p2 }
  0x4d   : > { %p3972_p5 = pnand %p3971_p3, %p3965_p6 }
  0x4f   : > { %3975 = shalt.err (!%p3972_p5)
}
  0x50   : > { %3728 = dma.hbm_to_vmem [thread:$0]  (!%p4432_p7), %s5243_s5, 2048, %s4436_s27, [#allocation10], %s5222_s15, %s5222_s15, %s5224_s11  }
  0x51   : > { %s3976_s16 = scalar_lea.hbm %s5205_s7, 2048 }
  0x52   : > { %p3977_p11 = scmp.ne.s32.totalorder %s5205_s7, %s3976_s16  ;;  %p3983_p0 = scmp.lt.u32.totalorder %s3976_s16, %s5205_s7 }
  0x54   : > { %p3979_p12 = pnand %p3977_p11, %p4448_p9 }
  0x56   : > { %p3980_p13 = pneg %p3979_p12 }
  0x58   : > { %p3985_p2 = pnand %p3983_p0, %p3980_p13 }
  0x5a   : > { %3988 = shalt.err (!%p3985_p2)
}
  0x5b   : > { %s3989_s27 = scalar_lea.vmem %s4438_s30, 2048  ;;  %p3997_p3 = scmp.lt.s32.totalorder %s4438_s30, %s4438_s30 }
  0x5c   : > { %p3990_p6 = scmp.ne.s32.totalorder %s4438_s30, %s3989_s27  ;;  %p3998_p5 = scmp.lt.s32.totalorder %s3989_s27, %s3989_s27 }
  0x5e   : > { %p3992_p8 = pnand %p3990_p6, %p4448_p9  ;;  %p3999_p11 = por %p3998_p5, %p3997_p3 }
  0x60   : > { %p3993_p10 = pneg %p3992_p8 }
  0x62   : > { %p4000_p12 = pnand %p3999_p11, %p3993_p10 }
  0x64   : > { %4003 = shalt.err (!%p4000_p12)
}
  0x65   : > { %3734 = dma.hbm_to_vmem [thread:$0]  (!%p4432_p7), %s5205_s7, 2048, %s4438_s30, [#allocation13], %s5222_s15, %s5222_s15, %s5224_s11  }
  0x66   : > { %s4295_s2 = smov [#allocation15]   ;;  %s4004_s17 = scalar_lea.hbm %s5207_s9, 8192 }
  0x67   : > { %s501_s14 = sshll.u32 %s4295_s2, 4  ;;  %p4005_p13 = scmp.ne.s32.totalorder %s5207_s9, %s4004_s17  ;;  %s502_s14 = int_to_ptr.vmem [resolvable:$true] %s501_s14 }
  0x68   : > { %p4011_p6 = scmp.lt.u32.totalorder %s4004_s17, %s5207_s9 }
  0x69   : > { %p4007_p0 = pnand %p4005_p13, %p4448_p9 }
  0x6b   : > { %p4008_p2 = pneg %p4007_p0 }
  0x6d   : > { %p4013_p8 = pnand %p4011_p6, %p4008_p2 }
  0x6f   : > { %4016 = shalt.err (!%p4013_p8)
}
  0x70   : > { %s4017_s30 = scalar_lea.vmem %s502_s14, 8192  ;;  %p4025_p11 = scmp.lt.s32.totalorder %s502_s14, %s502_s14 }
  0x71   : > { %p4018_p10 = scmp.ne.s32.totalorder %s502_s14, %s4017_s30  ;;  %p4026_p12 = scmp.lt.s32.totalorder %s4017_s30, %s4017_s30 }
  0x73   : > { %p4020_p3 = pnand %p4018_p10, %p4448_p9  ;;  %p4027_p1 = por %p4026_p12, %p4025_p11 }
  0x75   : > { %p4021_p5 = pneg %p4020_p3 }
  0x77   : > { %p4028_p4 = pnand %p4027_p1, %p4021_p5 }
  0x79   : > { %4031 = shalt.err (!%p4028_p4)
}
  0x7a   : > { %s5226_s23 = smov 512   ;;  %s4297_s1 = smov 32  }
  0x7b   : > { %3740 = dma.hbm_to_vmem [thread:$0]  (!%p4432_p7), %s5207_s9, 8192, %s502_s14, [#allocation16], %s5226_s23, %s5226_s23, %s4297_s1  }
  0x7c   : > { %s4298_s16 = smov [#allocation3]   ;;  %s5244_s0 = sld [smem:[#allocation29_spill]] }
  0x7d   : > { %s404_s17 = sshll.u32 %s4298_s16, 4  ;;  %s405_s17 = int_to_ptr.vmem [resolvable:$true] %s404_s17 }
  0x82   : > { %s4032_s12 = scalar_lea.hbm %s5244_s0, 32 }
  0x83   : > { %p4033_p1 = scmp.ne.s32.totalorder %s5244_s0, %s4032_s12  ;;  %p4039_p0 = scmp.lt.u32.totalorder %s4032_s12, %s5244_s0 }
  0x85   : > { %p4035_p4 = pnand %p4033_p1, %p4448_p9 }
  0x87   : > { %p4036_p13 = pneg %p4035_p4 }
  0x89   : > { %p4041_p2 = pnand %p4039_p0, %p4036_p13 }
  0x8b   : > { %4044 = shalt.err (!%p4041_p2)
}
  0x8c   : > { %s4045_s14 = scalar_lea.vmem %s405_s17, 32  ;;  %p4053_p3 = scmp.lt.s32.totalorder %s405_s17, %s405_s17 }
  0x8d   : > { %p4046_p6 = scmp.ne.s32.totalorder %s405_s17, %s4045_s14  ;;  %p4054_p5 = scmp.lt.s32.totalorder %s4045_s14, %s4045_s14 }
  0x8f   : > { %p4048_p8 = pnand %p4046_p6, %p4448_p9  ;;  %p4055_p11 = por %p4054_p5, %p4053_p3 }
  0x91   : > { %p4049_p10 = pneg %p4048_p8 }
  0x93   : > { %p4056_p12 = pnand %p4055_p11, %p4049_p10 }
  0x95   : > { %4059 = shalt.err (!%p4056_p12)
}
  0x96   : > { %s4299_s1 = smov 16   ;;  %s4300_s2 = smov 1  }
  0x97   : > { %3719 = dma.hbm_to_vmem [thread:$0]  (!%p4432_p7), %s5244_s0, 32, %s405_s17, [#allocation4], %s4299_s1, %s4299_s1, %s4300_s2  }
  0x98   : > { %s4301_s25 = smov [#allocation8]   ;;  %s4302_s22 = smov [#allocation11]  }
  0x99   : > { %s436_s16 = sshll.u32 %s4301_s25, 4  ;;  %s462_s29 = sshll.u32 %s4302_s22, 4  ;;  %s437_s16 = int_to_ptr.vmem [resolvable:$true] %s436_s16  ;;  %s463_s29 = int_to_ptr.vmem [resolvable:$true] %s462_s29 }
  0x9a   : > { %s5245_s4 = sld [smem:[#allocation33_spill]] }
  0xa0   : > { %s4060_s30 = scalar_lea.hbm %s5245_s4, 512 }
  0xa1   : > { %p4061_p1 = scmp.ne.s32.totalorder %s5245_s4, %s4060_s30  ;;  %p4067_p0 = scmp.lt.u32.totalorder %s4060_s30, %s5245_s4 }
  0xa3   : > { %p4063_p4 = pnand %p4061_p1, %p4448_p9 }
  0xa5   : > { %p4064_p13 = pneg %p4063_p4 }
  0xa7   : > { %p4069_p2 = pnand %p4067_p0, %p4064_p13 }
  0xa9   : > { %4072 = shalt.err (!%p4069_p2)
}
  0xaa   : > { %s4073_s17 = scalar_lea.vmem %s437_s16, 512  ;;  %p4081_p3 = scmp.lt.s32.totalorder %s437_s16, %s437_s16 }
  0xab   : > { %p4074_p6 = scmp.ne.s32.totalorder %s437_s16, %s4073_s17  ;;  %p4082_p5 = scmp.lt.s32.totalorder %s4073_s17, %s4073_s17 }
  0xad   : > { %p4076_p8 = pnand %p4074_p6, %p4448_p9  ;;  %p4083_p11 = por %p4082_p5, %p4081_p3 }
  0xaf   : > { %p4077_p10 = pneg %p4076_p8 }
  0xb1   : > { %p4084_p12 = pnand %p4083_p11, %p4077_p10 }
  0xb3   : > { %4087 = shalt.err (!%p4084_p12)
}
  0xb4   : > { %s5246_s23 = smov 8   ;;  %s5247_s2 = smov 128  }
  0xb5   : > { %3725 = dma.hbm_to_vmem [thread:$0]  (!%p4432_p7), %s5245_s4, 512, %s437_s16, [#allocation7], %s5247_s2, %s5247_s2, %s5246_s23  }
  0xb6   : > { %s4088_s25 = scalar_lea.hbm %s5204_s6, 2048 }
  0xb7   : > { %p4089_p1 = scmp.ne.s32.totalorder %s5204_s6, %s4088_s25  ;;  %p4095_p0 = scmp.lt.u32.totalorder %s4088_s25, %s5204_s6 }
  0xb9   : > { %p4091_p4 = pnand %p4089_p1, %p4448_p9 }
  0xbb   : > { %p4092_p13 = pneg %p4091_p4 }
  0xbd   : > { %p4097_p2 = pnand %p4095_p0, %p4092_p13 }
  0xbf   : > { %4100 = shalt.err (!%p4097_p2)
}
  0xc0   : > { %s4101_s14 = scalar_lea.vmem %s463_s29, 2048  ;;  %p4109_p3 = scmp.lt.s32.totalorder %s463_s29, %s463_s29 }
  0xc1   : > { %p4102_p6 = scmp.ne.s32.totalorder %s463_s29, %s4101_s14  ;;  %p4110_p5 = scmp.lt.s32.totalorder %s4101_s14, %s4101_s14 }
  0xc3   : > { %p4104_p8 = pnand %p4102_p6, %p4448_p9  ;;  %p4111_p11 = por %p4110_p5, %p4109_p3 }
  0xc5   : > { %p4105_p10 = pneg %p4104_p8 }
  0xc7   : > { %p4112_p12 = pnand %p4111_p11, %p4105_p10 }
  0xc9   : > { %4115 = shalt.err (!%p4112_p12)
}
  0xca   : > { %3731 = dma.hbm_to_vmem [thread:$0]  (!%p4432_p7), %s5204_s6, 2048, %s463_s29, [#allocation10], %s5247_s2, %s5247_s2, %s5246_s23  }
  0xcb   : > { %s4303_s3 = smov [#allocation14]   ;;  %s4304_s15 = smov [#allocation17]  }
  0xcc   : > { %s488_s5 = sshll.u32 %s4303_s3, 4  ;;  %s514_s11 = sshll.u32 %s4304_s15, 4  ;;  %s489_s5 = int_to_ptr.vmem [resolvable:$true] %s488_s5  ;;  %s515_s11 = int_to_ptr.vmem [resolvable:$true] %s514_s11 }
  0xcd   : > { %s4116_s12 = scalar_lea.hbm %s5206_s8, 2048 }
  0xce   : > { %p4117_p1 = scmp.ne.s32.totalorder %s5206_s8, %s4116_s12  ;;  %p4123_p0 = scmp.lt.u32.totalorder %s4116_s12, %s5206_s8 }
  0xd0   : > { %p4119_p4 = pnand %p4117_p1, %p4448_p9 }
  0xd2   : > { %p4120_p13 = pneg %p4119_p4 }
  0xd4   : > { %p4125_p2 = pnand %p4123_p0, %p4120_p13 }
  0xd6   : > { %4128 = shalt.err (!%p4125_p2)
}
  0xd7   : > { %s4129_s29 = scalar_lea.vmem %s489_s5, 2048  ;;  %p4137_p3 = scmp.lt.s32.totalorder %s489_s5, %s489_s5 }
  0xd8   : > { %p4130_p6 = scmp.ne.s32.totalorder %s489_s5, %s4129_s29  ;;  %p4138_p5 = scmp.lt.s32.totalorder %s4129_s29, %s4129_s29 }
  0xda   : > { %p4132_p8 = pnand %p4130_p6, %p4448_p9  ;;  %p4139_p11 = por %p4138_p5, %p4137_p3 }
  0xdc   : > { %p4133_p10 = pneg %p4132_p8 }
  0xde   : > { %p4140_p12 = pnand %p4139_p11, %p4133_p10 }
  0xe0   : > { %4143 = shalt.err (!%p4140_p12)
}
  0xe1   : > { %3737 = dma.hbm_to_vmem [thread:$0]  (!%p4432_p7), %s5206_s8, 2048, %s489_s5, [#allocation13], %s5247_s2, %s5247_s2, %s5246_s23  }
  0xe2   : > { %s4144_s22 = scalar_lea.hbm %s5208_s10, 8192 }
  0xe3   : > { %p4145_p1 = scmp.ne.s32.totalorder %s5208_s10, %s4144_s22  ;;  %p4151_p0 = scmp.lt.u32.totalorder %s4144_s22, %s5208_s10 }
  0xe5   : > { %p4147_p4 = pnand %p4145_p1, %p4448_p9 }
  0xe7   : > { %p4148_p13 = pneg %p4147_p4 }
  0xe9   : > { %p4153_p2 = pnand %p4151_p0, %p4148_p13 }
  0xeb   : > { %4156 = shalt.err (!%p4153_p2)
}
  0xec   : > { %s4157_s16 = scalar_lea.vmem %s515_s11, 8192  ;;  %p4165_p3 = scmp.lt.s32.totalorder %s515_s11, %s515_s11 }
  0xed   : > { %p4158_p6 = scmp.ne.s32.totalorder %s515_s11, %s4157_s16  ;;  %p4166_p5 = scmp.lt.s32.totalorder %s4157_s16, %s4157_s16 }
  0xef   : > { %p4160_p8 = pnand %p4158_p6, %p4448_p9  ;;  %p4167_p11 = por %p4166_p5, %p4165_p3 }
  0xf1   : > { %p4161_p10 = pneg %p4160_p8 }
  0xf3   : > { %p4168_p12 = pnand %p4167_p11, %p4161_p10 }
  0xf5   : > { %4171 = shalt.err (!%p4168_p12)
}
  0xf6   : > { %3743 = dma.hbm_to_vmem [thread:$0]  (!%p4432_p7), %s5208_s10, 8192, %s515_s11, [#allocation16], %s5247_s2, %s5247_s2, %s5246_s23  }
  0xf7   : > { %s2908_s28 = sadd.s32 4294967294, %s4288_s21   ;;  %s4650_s26 = sadd.s32 1, %s4288_s21  }
  0xf8   : > { %s316_s17 = sadd.s32 1, %s4284_s20  ;;  %s313_s3 = ssub.s32 %s4288_s21, %s4650_s26 }
  0xf9   : > { %p323_p9 = scmp.ne.s32.totalorder %s4284_s20, %s4280_s19  ;;  %p314_p1 = scmp.eq.s32.totalorder %s313_s3, 0 }
  0xfa   : > { %p324_p4 = scmp.eq.s32.totalorder %s4288_s21, 0  ;;  %p329_p13 = scmp.ne.s32.totalorder %s4280_s19, %s4276_s18 }
  0xfb   : > { %p379_p0 = scmp.eq.s32.totalorder %s4415_s24, 1  ;;  %p5248_p6 = scmp.eq.s32.totalorder %s4415_s24, 0 }
  0xfc   : > { %s4662_s15 = scalar_select %p314_p1, %s4284_s20, %s316_s17  }
  0xfd   : > { %p325_p2 = por %p324_p4, %p323_p9  ;;  %p4666_p8 = por %p5248_p6, %p329_p13 }
  0xfe   : > { %p4670_p7 = por %p379_p0, %p323_p9  ;;  %p385_p10 = scmp.eq.s32.totalorder %s2908_s28, 1 }
  0xff   : > { %p3761_p3 = scmp.lt.s32.totalorder %s4288_s21, 2  ;;  %s534_s2 = sand.u32 1, %s4284_s20  }
 0x100   : > { %s5250_s23 = scalar_select %p4670_p7, 1, 0 }
 0x101   : > { %p4676_p5 = por %p385_p10, %p329_p13  ;;  %s2920_s22 = sshll.u32 %s534_s2, 8 }
 0x102   : > { %s2960_s12 = sshll.u32 %s4288_s21, 8  ;;  %s538_s16 = scalar_lea.vmem [#allocation18], %s2920_s22 }
 0x103   : > { %s5251_s11 = scalar_select %p4676_p5, 1, 0 }
 0x104   : > { %s4684_s14 = scalar_lea.hbm %s5211_s13, %s2960_s12  ;;  %s545_s5 = sshll.u32 %s538_s16, 4  ;;  %s4690_s5 = int_to_ptr.vmem [resolvable:$true] %s545_s5 }
 0x105   : > { %p4686_p11 = pnand %p3761_p3, %p325_p2  ;;  %s4692_s28 = scalar_lea.sflag [#allocation19], %s534_s2 }
 0x106   : > { %s4172_s17 = scalar_lea.hbm %s4684_s14, 4096  ;;  %s4177_s12 = scalar_lea.hbm %s5211_s13, 8192 }
 0x107   : > { %p4173_p12 = scmp.ne.s32.totalorder %s4684_s14, %s4172_s17  ;;  %p4174_p9 = pneg %p4686_p11 }
 0x108   : > { %p4178_p13 = scmp.lt.u32.totalorder %s4684_s14, %s5211_s13  ;;  %p4179_p0 = scmp.lt.u32.totalorder %s4177_s12, %s4172_s17 }
 0x109   : > { %p4175_p1 = pnand %p4174_p9, %p4173_p12  ;;  %p4181_p6 = scmp.lt.u32.totalorder %s4172_s17, %s4684_s14 }
 0x10a   : > { %p4180_p2 = por %p4179_p0, %p4178_p13 }
 0x10b   : > { %p4176_p4 = pneg %p4175_p1 }
 0x10c   : > { %p4182_p10 = por %p4181_p6, %p4180_p2 }
 0x10e   : > { %p4183_p3 = pnand %p4182_p10, %p4176_p4 }
 0x110   : > { %4186 = shalt.err (!%p4183_p3)
}
 0x111   : > { %s4187_s2 = scalar_lea.vmem %s4690_s5, 4096  ;;  %s4305_s16 = smov [#allocation18]  }
 0x112   : > { %p4188_p12 = scmp.ne.s32.totalorder %s4690_s5, %s4187_s2  ;;  %s4192_s3 = sshll.u32 %s4305_s16, 4  ;;  %s4193_s3 = int_to_ptr.vmem [resolvable:$false] %s4192_s3 }
 0x113   : > { %s4194_s22 = scalar_lea.vmem %s4193_s3, 8192  ;;  %p4195_p7 = scmp.lt.s32.totalorder %s4690_s5, %s4193_s3 }
 0x114   : > { %p4190_p1 = pnand %p4188_p12, %p4174_p9  ;;  %p4196_p13 = scmp.lt.s32.totalorder %s4194_s22, %s4187_s2 }
 0x116   : > { %p4191_p5 = pneg %p4190_p1  ;;  %p4197_p0 = por %p4196_p13, %p4195_p7 }
 0x118   : > { %p4198_p2 = pnand %p4197_p0, %p4191_p5 }
 0x11a   : > { %4201 = shalt.err (!%p4198_p2)
}
 0x11b   : > { %s4306_s17 = smov 256   ;;  %s5253_s12 = smov 512  }
 0x11c   : > { %3747 = dma.hbm_to_vmem [thread:$0]  (!%p4686_p11), %s4684_s14, 4096, %s4690_s5, %s4692_s28, %s5253_s12, %s4306_s17, %s4299_s1  }
 0x11d   : > { %s5254_s27 = sld [smem:[#allocation28_spill]] }
 0x123   : > { %p5255_p9 = scmp.ne.s32.totalorder %s5254_s27, 0 }
 0x124   : > { %p5256_p4 = scmp.eq.s32.totalorder (!%p5255_p9), %s4415_s24, 0 }
 0x125   : > { %565 = sbr.rel (%p5255_p9) target bundleno = 3293 (0xcdd), region = 80 }
 0x12c   : > { %4247 = dma.done.wait (%p5256_p4), [#allocation4], 32   ;;  %p5257_p6 = pmov %p5256_p4 }
 0x12d   : > { %p5258_p7 = pmov %p5256_p4 }
 0x12e   : > { %4249 = vsyncadd (%p5257_p6), [#allocation4], 4294967264 }
 0x12f   : > { %4251 = dma.done.wait (%p5258_p7), [#allocation7], 1024   ;;  %p5259_p5 = pmov %p5256_p4 }
 0x130   : > { %p5260_p10 = pmov %p5256_p4 }
 0x131   : > { %4253 = vsyncadd (%p5259_p5), [#allocation7], 4294966272 }
 0x132   : > { %4255 = dma.done.wait (%p5260_p10), [#allocation10], 4096   ;;  %p5261_p11 = pmov %p5256_p4 }
 0x133   : > { %p5262_p3 = pmov %p5256_p4 }
 0x134   : > { %4257 = vsyncadd (%p5261_p11), [#allocation10], 4294963200 }
 0x135   : > { %4259 = dma.done.wait (%p5262_p3), [#allocation13], 4096   ;;  %p5263_p12 = pmov %p5262_p3 }
 0x136   : > { %p5264_p1 = pmov %p5262_p3 }
 0x137   : > { %4261 = vsyncadd (%p5263_p12), [#allocation13], 4294963200 }
 0x138   : > { %4263 = dma.done.wait (%p5264_p1), [#allocation16], 16384   ;;  %p5265_p13 = pmov %p5264_p1 }
 0x139   : > { %s4745_s1 = sand.u32 1, %s4280_s19  }
 0x13a   : > { %4265 = vsyncadd (%p5265_p13), [#allocation16], 4294950912  ;;  %s2933_s14 = sshll.u32 %s4745_s1, 8  ;;  %s604_s5 = scalar_lea.sflag [#allocation19], %s4745_s1 }
 0x13b   : > { %s4749_s29 = scalar_lea.vmem [#allocation18], %s2933_s14 }
 0x13c   : > { %4267 = dma.done.wait (%p4666_p8), %s604_s5, 4096  }
 0x13d   : > { %4269 = vsyncadd (%p4666_p8), %s604_s5, 4294963200  ;;  %s2934_s28 = sshll.u32 %s4745_s1, 6  ;;  %s2935_s30 = sshll.u32 %s4415_s24, 1 }
 0x13e   : > { %p660_p0 = scmp.lt.s32.totalorder %s2935_s30, 3  ;;  %s5266_s3 = sld [smem:[#allocation37_spill]] }
 0x13f   : > { %s4763_s17 = scalar_lea.vmem [#allocation20], %s2934_s28  ;;  %p5267_p2 = scmp.ne.s32.totalorder %s4415_s24, 0 }
 0x140   : > { %s5283_s30 = smov (!%p660_p0, %s2935_s30), 3  ;;  %s5268_s27 = sld [smem:[#allocation30_spill]] (!%p5267_p2)  ;;  %v4307_v3 = vmov (!%p5267_p2), 0   ;;  %v4308_v5 = vmov (!%p5267_p2), 0.0   ;;  %v723_v12 = vlaneseq (!%p5267_p2)  ;;  %v677_v13 = vld [vmem:[#allocation3] sm:$0x1] (!%p5267_p2) }
 0x141   : > { %668 = sbr.rel (%p5267_p2) target bundleno = 3023 (0xbcf), region = 124  ;;  %3826 = vset.pattern.permute.xlu0 (!%p5267_p2), %v4307_v3  ;;  %3837 = vset.pattern.permute.xlu1 (!%p5267_p2), %v4307_v3  ;;  %vm679_vm4 = vcmp.ge.f32.partialorder (!%p5267_p2), %v677_v13, 2.0  ;;  %v678_v15 = vld [vmem:[#allocation3 + $0x1] sm:$0x1] (!%p5267_p2)  ;;  %s5269_s16 = sld [smem:[#allocation31_spill]] (!%p5267_p2)  ;;  %vm741_vm6 = vcmask (!%p5267_p2), 130048  }
 0x142   : > { %v4783_v14 = vshrl.u32 (!%p5267_p2), %v723_v12, 7  ;;  %v2937_v17 = vsel (!%p5267_p2), %vm679_vm4, 1.0, %v4308_v5  ;;  %vm680_vm5 = vcmp.ge.f32.partialorder (!%p5267_p2), %v678_v15, 2.0  ;;  %v673_v44 = vld [vmem:[#allocation6] sm:$0xff] (!%p5267_p2)  ;;  %v674_v45 = vld [vmem:[#allocation6 + $0x8] sm:$0xff] (!%p5267_p2)  ;;  %v675_v48 = vld [vmem:[#allocation6 + $0x10] sm:$0xff] (!%p5267_p2) }
 0x143   : > { %v2938_v20 = vsel (!%p5267_p2), %vm680_vm5, 1.0, %v4308_v5  ;;  %v3348_v47 = vpack.c.bf16 (!%p5267_p2), %v674_v45, %v673_v44  ;;  %v676_v49 = vld [vmem:[#allocation6 + $0x18] sm:$0xff] (!%p5267_p2)  ;;  %s5270_s4 = sld [smem:[#allocation35_spill]] (!%p5267_p2)  ;;  %s5271_s25 = sld [smem:[#allocation36_spill]] (!%p5267_p2) }
 0x144   : > { %s662_s22 = scalar_lea.vmem %s5266_s3, %s5283_s30  ;;  %v4786_v16 = vsub.s32 (!%p5267_p2), 0, %v4783_v14  ;;  %v3352_v50 = vpack.c.bf16 (!%p5267_p2), %v676_v49, %v675_v48 }
 0x145   : > { %3349 = vmatprep.subr.bf16.mxu0 (!%p5267_p2), %v3348_v47 }
 0x146   : > { %v685_v0 = vld [vmem:[%s5268_s27] sm:$0xff] (!%p5267_p2)  ;;  %v686_v1 = vld [vmem:[%s5268_s27 + $0x8] sm:$0xff] (!%p5267_p2)  ;;  %v687_v2 = vld [vmem:[%s5268_s27 + $0x10] sm:$0xff] (!%p5267_p2)  ;;  %v726_v18 = vrot.slane (!%p5267_p2), %v2937_v17, %v4786_v16  ;;  %v730_v25 = vrot.slane (!%p5267_p2), %v2938_v20, %v4786_v16  ;;  %3351 = vmatpush3.bf16.msra.mxu0 (!%p5267_p2), %v3348_v47 }
 0x147   : > { %vm689_vm0 = vcmp.eq.f32.partialorder (!%p5267_p2), %v685_v0, 0.0  ;;  %vm690_vm1 = vcmp.eq.f32.partialorder (!%p5267_p2), %v686_v1, 0.0  ;;  %v688_v4 = vld [vmem:[%s5268_s27 + $0x18] sm:$0xff] (!%p5267_p2)  ;;  %vm691_vm2 = vcmp.eq.f32.partialorder (!%p5267_p2), %v687_v2, 0.0  ;;  %v4794_v23 = vld [vmem:[%s5269_s16] sm:$0xff] (!%p5267_p2)  ;;  %v4800_v28 = vld [vmem:[%s5269_s16 + $0x8] sm:$0xff] (!%p5267_p2)  ;;  %3353 = vmatprep.subr.bf16.mxu0 (!%p5267_p2), %v3352_v50 }
 0x148   : > { %v2939_v6 = vsel %vm689_vm0, 1.0, %v4308_v5  ;;  %v2940_v7 = vsel %vm690_vm1, 1.0, %v4308_v5  ;;  %vm692_vm3 = vcmp.eq.f32.partialorder %v688_v4, 0.0  ;;  %v2941_v8 = vsel %vm691_vm2, 1.0, %v4308_v5  ;;  %v4806_v32 = vld [vmem:[%s5269_s16 + $0x10] sm:$0xff]  ;;  %v4813_v37 = vld [vmem:[%s5269_s16 + $0x18] sm:$0xff] }
 0x149   : > { %v3827_v9 = vpack.i.bf16 %v2940_v7, %v2939_v6  ;;  %v2942_v10 = vsel %vm692_vm3, 1.0, %v4308_v5  ;;  %v766_v43 = vsub.f32 1.0, %v2939_v6  ;;  %v767_v46 = vsub.f32 1.0, %v2940_v7  ;;  %v962_v17 = vld [vmem:[#allocation8] sm:$0xff]  ;;  %v1146_v47 = vld [vmem:[#allocation11 + $0x10] sm:$0xff] }
 0x14a   : > { %v3832_v11 = vpack.i.bf16 %v2942_v10, %v2941_v8  ;;  %v768_v51 = vsub.f32 1.0, %v2941_v8  ;;  %v769_v52 = vsub.f32 1.0, %v2942_v10 }
 0x14b   : > { %3828 = vperm.xlu0 %3826, %v3827_v9  }
 0x14f   : > { %3833 = vperm.xlu0 %3826, %v3832_v11   ;;  %v963_v11 = vld [vmem:[#allocation8 + $0x8] sm:$0xff] }
 0x1ca   : > { %v3829_v19 = vpop.permute.xlu0 %3828 }
 0x1cb   : > { %v3831_v21 = vunpack.i.h.bf16 %v3829_v19  ;;  %v3830_v22 = vunpack.i.l.bf16 %v3829_v19 }
 0x1cd   : > { %v734_v24 = vmul.f32 %v3831_v21, %v726_v18  ;;  %v733_v26 = vmul.f32 %v3830_v22, %v726_v18 }
 0x1ce   : > { %v3834_v27 = vpop.permute.xlu0 %3833 }
 0x1cf   : > { %v3836_v29 = vunpack.i.h.bf16 %v3834_v27  ;;  %v3835_v30 = vunpack.i.l.bf16 %v3834_v27  ;;  %v737_v31 = vmul.f32 %v733_v26, %v4794_v23  ;;  %v738_v36 = vmul.f32 %v734_v24, %v4800_v28 }
 0x1d1   : > { %v735_v33 = vmul.f32 %v3835_v30, %v730_v25  ;;  %v736_v34 = vmul.f32 %v3836_v29, %v730_v25  ;;  %v742_v35 = vsel %vm741_vm6, %v737_v31, 0.0  ;;  %v745_v40 = vsel %vm741_vm6, %v738_v36, 0.0  ;;  %v965_v30 = vld [vmem:[#allocation8 + $0x18] sm:$0xff] }
 0x1d2   : > { %743 = vadd.xlane.f32.xlu1 %v742_v35  ;;  %v1039_v35 = vld [vmem:[#allocation9] sm:$0xff] }
 0x1d3   : > { %v739_v38 = vmul.f32 %v735_v33, %v4806_v32  ;;  %v740_v41 = vmul.f32 %v736_v34, %v4813_v37 }
 0x1d5   : > { %v748_v39 = vsel %vm741_vm6, %v739_v38, 0.0  ;;  %v751_v42 = vsel %vm741_vm6, %v740_v41, 0.0 }
 0x1d6   : > { %749 = vadd.xlane.f32.xlu0 %v748_v39  ;;  %746 = vadd.xlane.f32.xlu1 %v745_v40  ;;  %v1144_v40 = vld [vmem:[#allocation11] sm:$0xff] }
 0x1da   : > { %752 = vadd.xlane.f32.xlu1 %v751_v42 }
 0x1eb   : > { %772 = vperm.xlu1 %3837, %v766_v43  }
 0x1ef   : > { %777 = vperm.xlu1 %3837, %v767_v46  }
 0x1f3   : > { %782 = vperm.xlu1 %3837, %v768_v51   ;;  %v1043_v51 = vld [vmem:[#allocation9 + $0x20] sm:$0xff] }
 0x1f7   : > { %787 = vperm.xlu1 %3837, %v769_v52   ;;  %v1044_v52 = vld [vmem:[#allocation9 + $0x28] sm:$0xff] }
 0x25f   : > { %v744_v53 = vpop.xlane.xlu1 %743 }
 0x260   : > { %v754_v54 = vadd.f32 1e-10, %v744_v53  ;;  %v3364_v53 = vpack.c.bf16 %v1044_v52, %v1043_v51 }
 0x262   : > { %3838 = vrcp.f32 %v754_v54  ;;  %v1148_v54 = vld [vmem:[#allocation11 + $0x20] sm:$0xff] }
 0x263   : > { %v750_v55 = vpop.xlane.xlu0 %749  ;;  %v747_v56 = vpop.xlane.xlu1 %746 }
 0x264   : > { %v756_v57 = vadd.f32 1e-10, %v750_v55  ;;  %v755_v58 = vadd.f32 1e-10, %v747_v56  ;;  %v1149_v55 = vld [vmem:[#allocation11 + $0x28] sm:$0xff] }
 0x265   : > { %v3396_v56 = vpack.c.bf16 %v1149_v55, %v1148_v54 }
 0x266   : > { %3840 = vrcp.f32 %v756_v57 }
 0x267   : > { %3842 = vrcp.f32 %v755_v58  ;;  %v753_v59 = vpop.xlane.xlu1 %752  ;;  %v1045_v58 = vld [vmem:[#allocation9 + $0x30] sm:$0xff] }
 0x268   : > { %v757_v60 = vadd.f32 1e-10, %v753_v59  ;;  %v1046_v59 = vld [vmem:[#allocation9 + $0x38] sm:$0xff] }
 0x26a   : > { %3844 = vrcp.f32 %v757_v60  ;;  %v3368_v60 = vpack.c.bf16 %v1046_v59, %v1045_v58 }
 0x26b   : > { %v773_v6 = vpop.permute.xlu1 %772 }
 0x26c   : > { %v3839_v61 = vpop.eup %3838  ;;  %v790_v9 = vmul.f32 %v773_v6, %v673_v44  ;;  %v1041_v44 = vld [vmem:[#allocation9 + $0x10] sm:$0xff] }
 0x26d   : > { %v759_v62 = vmul.f32 %v3839_v61, %v737_v31  ;;  %v1150_v61 = vld [vmem:[#allocation11 + $0x30] sm:$0xff] }
 0x26f   : > { %3158 = vmatprep.mubr.msk.f32.mxu0 %vm741_vm6, %v759_v62  ;;  %v778_v7 = vpop.permute.xlu1 %777  ;;  %v1151_v62 = vld [vmem:[#allocation11 + $0x38] sm:$0xff] }
 0x270   : > { %v3841_v63 = vpop.eup %3840  ;;  %v791_v8 = vmul.f32 %v778_v7, %v674_v45  ;;  %v1042_v45 = vld [vmem:[#allocation9 + $0x18] sm:$0xff]  ;;  %v1049_v7 = vld [vmem:[#allocation9 + $0x50] sm:$0xff] }
 0x271   : > { %v3843_v0 = vpop.eup %3842  ;;  %v763_v1 = vmul.f32 %v3841_v63, %v739_v38  ;;  %v964_v38 = vld [vmem:[#allocation8 + $0x10] sm:$0xff]  ;;  %v3360_v46 = vpack.c.bf16 %v1042_v45, %v1041_v44  ;;  %v3400_v63 = vpack.c.bf16 %v1151_v62, %v1150_v61 }
 0x272   : > { %v761_v2 = vmul.f32 %v3843_v0, %v738_v36  ;;  %v1040_v36 = vld [vmem:[#allocation9 + $0x8] sm:$0xff]  ;;  %v1047_v0 = vld [vmem:[#allocation9 + $0x40] sm:$0xff] }
 0x273   : > { %v783_v12 = vpop.permute.xlu1 %782  ;;  %v3356_v39 = vpack.c.bf16 %v1040_v36, %v1039_v35 }
 0x274   : > { %v3845_v3 = vpop.eup %3844  ;;  %3159 = vmatmul.mubr.msk.f32.vlgmr.msra.gmra.mrb[0].mxu0 %vm741_vm6, %v761_v2  ;;  %v792_v31 = vmul.f32 %v783_v12, %v675_v48  ;;  %v1147_v48 = vld [vmem:[#allocation11 + $0x18] sm:$0xff] }
 0x275   : > { %3355 = vmatpush3.bf16.msra.mxu0 %v3352_v50  ;;  %3165 = vmatprep.mubr.msk.f32.mxu0 %vm741_vm6, %v763_v1  ;;  %v765_v4 = vmul.f32 %v3845_v3, %v740_v41  ;;  %v1145_v41 = vld [vmem:[#allocation11 + $0x8] sm:$0xff]  ;;  %v1152_v3 = vld [vmem:[#allocation11 + $0x40] sm:$0xff] }
 0x276   : > { %v3388_v42 = vpack.c.bf16 %v1145_v41, %v1144_v40  ;;  %3357 = vmatprep.subr.bf16.mxu0 %v3356_v39  ;;  %v1048_v1 = vld [vmem:[#allocation9 + $0x48] sm:$0xff] }
 0x277   : > { %v788_v24 = vpop.permute.xlu1 %787  ;;  %v3372_v2 = vpack.c.bf16 %v1048_v1, %v1047_v0 }
 0x278   : > { %3166 = vmatmul.mubr.msk.f32.vlgmr.msra.gmra.mrb[2].mxu0 %vm741_vm6, %v765_v4  ;;  %v793_v26 = vmul.f32 %v788_v24, %v676_v49  ;;  %3389 = vmatprep.subr.bf16.mxu1 %v3388_v42  ;;  %v3392_v49 = vpack.c.bf16 %v1147_v48, %v1146_v47  ;;  %v1153_v4 = vld [vmem:[#allocation11 + $0x48] sm:$0xff]  ;;  %v1053_v24 = vld [vmem:[#allocation9 + $0x70] sm:$0xff] }
 0x279   : > { %3359 = vmatpush3.bf16.msra.mxu0 %v3356_v39  ;;  %3391 = vmatpush3.bf16.msra.mxu1 %v3388_v42  ;;  %v3404_v6 = vpack.c.bf16 %v1153_v4, %v1152_v3  ;;  %v4856_v3 = vld [vmem:[%s5271_s25] sm:$0x7] }
 0x27a   : > { %3361 = vmatprep.subr.bf16.mxu0 %v3360_v46  ;;  %3393 = vmatprep.subr.bf16.mxu1 %v3392_v49 }
 0x27d   : > { %3363 = vmatpush3.bf16.msra.mxu0 %v3360_v46  ;;  %3395 = vmatpush3.bf16.msra.mxu1 %v3392_v49 }
 0x27e   : > { %3365 = vmatprep.subr.bf16.mxu0 %v3364_v53  ;;  %3397 = vmatprep.subr.bf16.mxu1 %v3396_v56 }
 0x281   : > { %3367 = vmatpush3.bf16.msra.mxu0 %v3364_v53  ;;  %3399 = vmatpush3.bf16.msra.mxu1 %v3396_v56  ;;  %v4847_v56 = vld [vmem:[%s5270_s4] sm:$0x7] }
 0x282   : > { %3369 = vmatprep.subr.bf16.mxu0 %v3368_v60  ;;  %3401 = vmatprep.subr.bf16.mxu1 %v3400_v63 }
 0x285   : > { %3371 = vmatpush3.bf16.msra.mxu0 %v3368_v60  ;;  %3403 = vmatpush3.bf16.msra.mxu1 %v3400_v63  ;;  %v1026_v63 = vrot.slane %v4847_v56, %v4786_v16 }
 0x286   : > { %3373 = vmatprep.subr.bf16.mxu0 %v3372_v2  ;;  %3405 = vmatprep.subr.bf16.mxu1 %v3404_v6 }
 0x289   : > { %3375 = vmatpush3.bf16.msra.mxu0 %v3372_v2  ;;  %3407 = vmatpush3.bf16.msra.mxu1 %v3404_v6 }
 0x347   : > { %v3160_v10 = vpop.f32.mrb[0].mxu0 }
 0x348   : > { %v957_v13 = vadd.f32 %v3160_v10, %v791_v8  ;;  %v866_v15 = vpop.f32.mrb[1].mxu0  ;;  %v1050_v8 = vld [vmem:[#allocation9 + $0x58] sm:$0xff]  ;;  %v1154_v10 = vld [vmem:[#allocation11 + $0x50] sm:$0xff] }
 0x349   : > { %v956_v18 = vadd.f32 %v866_v15, %v790_v9  ;;  %v3376_v9 = vpack.c.bf16 %v1050_v8, %v1049_v7  ;;  %v1052_v15 = vld [vmem:[#allocation9 + $0x68] sm:$0xff] }
 0x34a   : > { %v4824_v19 = vadd.f32 %v963_v11, %v957_v13  ;;  %v1155_v11 = vld [vmem:[#allocation11 + $0x58] sm:$0xff]  ;;  %v1051_v13 = vld [vmem:[#allocation9 + $0x60] sm:$0xff] }
 0x34b   : > { %v4826_v20 = vadd.f32 %v962_v17, %v956_v18  ;;  %v3167_v21 = vpop.f32.mrb[2].mxu0  ;;  %v3408_v12 = vpack.c.bf16 %v1155_v11, %v1154_v10  ;;  %3377 = vmatprep.subr.bf16.mxu0 %v3376_v9  ;;  %v3380_v17 = vpack.c.bf16 %v1052_v15, %v1051_v13  ;;  %v1156_v18 = vld [vmem:[#allocation11 + $0x60] sm:$0xff]  ;;  %v1034_v10 = vrot.slane %v4856_v3, %v4786_v16  ;;  %v1247_v13 = vld [vmem:[#allocation12 + $0x10] sm:$0xff] }
 0x34c   : > { %v947_v22 = vpop.f32.mrb[3].mxu0  ;;  %972 = vadd.xlane.f32.xlu1 %v4824_v19  ;;  %v984_v25 = vmul.f32 %v4824_v19, %v4824_v19  ;;  %v959_v27 = vadd.f32 %v3167_v21, %v793_v26  ;;  %3379 = vmatpush3.bf16.msra.mxu0 %v3376_v9  ;;  %v1157_v21 = vld [vmem:[#allocation11 + $0x68] sm:$0xff] }
 0x34d   : > { %970 = vadd.xlane.f32.xlu0 %v4826_v20  ;;  %v983_v29 = vmul.f32 %v4826_v20, %v4826_v20  ;;  %v958_v34 = vadd.f32 %v947_v22, %v792_v31  ;;  %3409 = vmatprep.subr.bf16.mxu1 %v3408_v12  ;;  %v3412_v22 = vpack.c.bf16 %v1157_v21, %v1156_v18  ;;  %v1245_v31 = vld [vmem:[#allocation12] sm:$0xff] }
 0x34e   : > { %v4834_v33 = vadd.f32 %v965_v30, %v959_v27  ;;  %3411 = vmatpush3.bf16.msra.mxu1 %v3408_v12  ;;  %3381 = vmatprep.subr.bf16.mxu0 %v3380_v17  ;;  %v1158_v27 = vld [vmem:[#allocation11 + $0x70] sm:$0xff] }
 0x34f   : > { %v4837_v43 = vadd.f32 %v964_v38, %v958_v34  ;;  %3413 = vmatprep.subr.bf16.mxu1 %v3412_v22  ;;  %v1246_v34 = vld [vmem:[#allocation12 + $0x8] sm:$0xff] }
 0x350   : > { %v986_v57 = vmul.f32 %v4834_v33, %v4834_v33  ;;  %3383 = vmatpush3.bf16.msra.mxu0 %v3380_v17  ;;  %v3420_v35 = vpack.c.bf16 %v1246_v34, %v1245_v31 }
 0x351   : > { %989 = vadd.xlane.f32.xlu0 %v984_v25  ;;  %v985_v50 = vmul.f32 %v4837_v43, %v4837_v43  ;;  %v1054_v25 = vld [vmem:[#allocation9 + $0x78] sm:$0xff] }
 0x352   : > { %3415 = vmatpush3.bf16.msra.mxu1 %v3412_v22  ;;  %v3384_v26 = vpack.c.bf16 %v1054_v25, %v1053_v24  ;;  %v1249_v22 = vld [vmem:[#allocation12 + $0x20] sm:$0xff]  ;;  %v1250_v24 = vld [vmem:[#allocation12 + $0x28] sm:$0xff] }
 0x353   : > { %v3428_v16 = vpack.c.bf16 %v1250_v24, %v1249_v22 }
 0x354   : > { %3385 = vmatprep.subr.bf16.mxu0 %v3384_v26 }
 0x355   : > { %987 = vadd.xlane.f32.xlu0 %v983_v29  ;;  %v1159_v29 = vld [vmem:[#allocation11 + $0x78] sm:$0xff]  ;;  %3387 = vmatpush3.bf16.msra.mxu0 %v3384_v26  ;;  %v1251_v26 = vld [vmem:[#allocation12 + $0x30] sm:$0xff] }
 0x356   : > { %v3416_v30 = vpack.c.bf16 %v1159_v29, %v1158_v27  ;;  %3421 = vmatprep.subr.bf16.mxu0 %v3420_v35  ;;  %v1252_v27 = vld [vmem:[#allocation12 + $0x38] sm:$0xff] }
 0x357   : > { %v3432_v31 = vpack.c.bf16 %v1252_v27, %v1251_v26  ;;  %v2950_v26 = vadd.f32 -1.0, %v4813_v37  ;;  %v2949_v27 = vadd.f32 -1.0, %v4806_v32 }
 0x358   : > { %3417 = vmatprep.subr.bf16.mxu1 %v3416_v30 }
 0x359   : > { %976 = vadd.xlane.f32.xlu0 %v4834_v33  ;;  %3419 = vmatpush3.bf16.msra.mxu1 %v3416_v30 }
 0x35d   : > { %974 = vadd.xlane.f32.xlu0 %v4837_v43 }
 0x361   : > { %991 = vadd.xlane.f32.xlu0 %v985_v50 }
 0x365   : > { %993 = vadd.xlane.f32.xlu0 %v986_v57 }
 0x3d9   : > { %v973_v36 = vpop.xlane.xlu1 %972 }
 0x3da   : > { %v971_v38 = vpop.xlane.xlu0 %970  ;;  %v980_v39 = vmul.f32 0.0078125, %v973_v36 }
 0x3db   : > { %v979_v42 = vmul.f32 0.0078125, %v971_v38  ;;  %v1253_v38 = vld [vmem:[#allocation12 + $0x40] sm:$0xff] }
 0x3dc   : > { %v1000_v41 = vmul.f32 %v980_v39, %v980_v39  ;;  %v1008_v58 = vsub.f32 %v4824_v19, %v980_v39  ;;  %v1254_v39 = vld [vmem:[#allocation12 + $0x48] sm:$0xff] }
 0x3dd   : > { %v999_v47 = vmul.f32 %v979_v42, %v979_v42  ;;  %v1007_v1 = vsub.f32 %v4826_v20, %v979_v42  ;;  %v1248_v20 = vld [vmem:[#allocation12 + $0x18] sm:$0xff]  ;;  %v3436_v42 = vpack.c.bf16 %v1254_v39, %v1253_v38 }
 0x3de   : > { %v990_v40 = vpop.xlane.xlu0 %989  ;;  %v3424_v21 = vpack.c.bf16 %v1248_v20, %v1247_v13 }
 0x3df   : > { %v996_v44 = vmul.f32 0.0078125, %v990_v40 }
 0x3e1   : > { %v1004_v45 = vsub.f32 %v996_v44, %v1000_v41  ;;  %v1255_v44 = vld [vmem:[#allocation12 + $0x50] sm:$0xff] }
 0x3e2   : > { %v988_v46 = vpop.xlane.xlu0 %987 }
 0x3e3   : > { %v1012_v48 = vadd.f32 1e-05, %v1004_v45  ;;  %v995_v49 = vmul.f32 0.0078125, %v988_v46  ;;  %v1256_v45 = vld [vmem:[#allocation12 + $0x58] sm:$0xff] }
 0x3e5   : > { %3846 = vrsqrt.f32 %v1012_v48  ;;  %v1003_v50 = vsub.f32 %v995_v49, %v999_v47  ;;  %v1257_v47 = vld [vmem:[#allocation12 + $0x60] sm:$0xff]  ;;  %v1258_v48 = vld [vmem:[#allocation12 + $0x68] sm:$0xff] }
 0x3e6   : > { %v977_v51 = vpop.xlane.xlu0 %976  ;;  %v3444_v49 = vpack.c.bf16 %v1258_v48, %v1257_v47 }
 0x3e7   : > { %v1011_v52 = vadd.f32 1e-05, %v1003_v50  ;;  %v982_v59 = vmul.f32 0.0078125, %v977_v51  ;;  %v1259_v50 = vld [vmem:[#allocation12 + $0x70] sm:$0xff]  ;;  %v1260_v51 = vld [vmem:[#allocation12 + $0x78] sm:$0xff] }
 0x3e9   : > { %3848 = vrsqrt.f32 %v1011_v52  ;;  %v1002_v6 = vmul.f32 %v982_v59, %v982_v59  ;;  %v1010_v34 = vsub.f32 %v4834_v33, %v982_v59  ;;  %v3440_v33 = vpack.c.bf16 %v1256_v45, %v1255_v44 }
 0x3ea   : > { %v975_v53 = vpop.xlane.xlu0 %974  ;;  %v3448_v52 = vpack.c.bf16 %v1260_v51, %v1259_v50 }
 0x3eb   : > { %v981_v54 = vmul.f32 0.0078125, %v975_v53 }
 0x3ed   : > { %v1001_v60 = vmul.f32 %v981_v54, %v981_v54  ;;  %v1009_v25 = vsub.f32 %v4837_v43, %v981_v54 }
 0x3ee   : > { %v992_v55 = vpop.xlane.xlu0 %991 }
 0x3ef   : > { %v3847_v57 = vpop.eup %3846  ;;  %v997_v61 = vmul.f32 0.0078125, %v992_v55 }
 0x3f0   : > { %v1020_v0 = vmul.f32 %v3847_v57, %v1008_v58 }
 0x3f1   : > { %v1005_v62 = vsub.f32 %v997_v61, %v1001_v60 }
 0x3f2   : > { %v994_v2 = vpop.xlane.xlu0 %993  ;;  %v1028_v11 = vmul.f32 %v1026_v63, %v1020_v0 }
 0x3f3   : > { %v3849_v4 = vpop.eup %3848  ;;  %v1013_v7 = vadd.f32 1e-05, %v1005_v62  ;;  %v998_v19 = vmul.f32 0.0078125, %v994_v2 }
 0x3f4   : > { %v1019_v8 = vmul.f32 %v3849_v4, %v1007_v1  ;;  %v4862_v18 = vadd.f32 %v1034_v10, %v1028_v11  ;;  %v2947_v11 = vadd.f32 -1.0, %v4794_v23  ;;  %v1352_v23 = vmul.f32 1e+09, %v2949_v27  ;;  %v1720_v27 = vld [vmem:[#allocation14 + $0x50] sm:$0xff] }
 0x3f5   : > { %3850 = vrsqrt.f32 %v1013_v7  ;;  %v1006_v9 = vsub.f32 %v998_v19, %v1002_v6 }
 0x3f6   : > { %v1027_v12 = vmul.f32 %v1026_v63, %v1019_v8  ;;  %v1350_v13 = vmul.f32 1e+09, %v2947_v11 }
 0x3f7   : > { %v1014_v15 = vadd.f32 1e-05, %v1006_v9 }
 0x3f8   : > { %v4860_v17 = vadd.f32 %v1034_v10, %v1027_v12  ;;  %v2948_v12 = vadd.f32 -1.0, %v4800_v28 }
 0x3f9   : > { %3852 = vrsqrt.f32 %v1014_v15 }
 0x3fa   : > { %3200 = vmatprep.mubr.f32.mxu0 %v4860_v17  ;;  %3238 = vmatprep.mubr.f32.mxu1 %v4860_v17  ;;  %v1351_v20 = vmul.f32 1e+09, %v2948_v12 }
 0x3fb   : > { %3201 = vmatmul.mubr.f32.vlgmr.msra.gmra.mrb[4].mxu0 %v4862_v18  ;;  %3239 = vmatmul.mubr.f32.vlgmr.msra.gmra.mrb[0].mxu1 %v4862_v18 }
 0x3fc   : > { %3423 = vmatpush3.bf16.msra.mxu0 %v3420_v35 }
 0x3fd   : > { %3425 = vmatprep.subr.bf16.mxu0 %v3424_v21 }
 0x3ff   : > { %v3851_v29 = vpop.eup %3850 }
 0x400   : > { %3427 = vmatpush3.bf16.msra.mxu0 %v3424_v21  ;;  %v1021_v30 = vmul.f32 %v3851_v29, %v1009_v25  ;;  %v1353_v29 = vmul.f32 1e+09, %v2950_v26 }
 0x401   : > { %3429 = vmatprep.subr.bf16.mxu0 %v3428_v16 }
 0x402   : > { %v1029_v36 = vmul.f32 %v1026_v63, %v1021_v30 }
 0x403   : > { %v3853_v40 = vpop.eup %3852 }
 0x404   : > { %3431 = vmatpush3.bf16.msra.mxu0 %v3428_v16  ;;  %v4870_v41 = vadd.f32 %v1034_v10, %v1029_v36  ;;  %v1022_v35 = vmul.f32 %v3853_v40, %v1010_v34 }
 0x405   : > { %3433 = vmatprep.subr.bf16.mxu0 %v3432_v31 }
 0x406   : > { %3203 = vmatprep.mubr.f32.mxu0 %v4870_v41  ;;  %3241 = vmatprep.mubr.f32.mxu1 %v4870_v41  ;;  %v1030_v43 = vmul.f32 %v1026_v63, %v1022_v35 }
 0x408   : > { %3435 = vmatpush3.bf16.msra.mxu0 %v3432_v31  ;;  %v4874_v46 = vadd.f32 %v1034_v10, %v1030_v43 }
 0x409   : > { %3437 = vmatprep.subr.bf16.mxu0 %v3436_v42 }
 0x40a   : > { %3204 = vmatmul.mubr.f32.gmra.mrb[6].mxu0 %v4874_v46  ;;  %3242 = vmatmul.mubr.f32.gmra.mrb[2].mxu1 %v4874_v46 }
 0x40b   : > { %3276 = vmatprep.mubr.f32.mxu0 %v4860_v17 }
 0x40c   : > { %3439 = vmatpush3.bf16.msra.mxu0 %v3436_v42 }
 0x40d   : > { %3441 = vmatprep.subr.bf16.mxu0 %v3440_v33 }
 0x410   : > { %3443 = vmatpush3.bf16.msra.mxu0 %v3440_v33 }
 0x411   : > { %3445 = vmatprep.subr.bf16.mxu0 %v3444_v49 }
 0x414   : > { %3447 = vmatpush3.bf16.msra.mxu0 %v3444_v49 }
 0x415   : > { %3449 = vmatprep.subr.bf16.mxu0 %v3448_v52 }
 0x418   : > { %3451 = vmatpush3.bf16.msra.mxu0 %v3448_v52 }
 0x41b   : > { %3277 = vmatmul.mubr.f32.vlgmr.msra.gmra.mrb[8].mxu0 %v4862_v18 }
 0x41c   : > { %3279 = vmatprep.mubr.f32.mxu0 %v4870_v41 }
 0x41f   : > { %3280 = vmatmul.mubr.f32.gmra.mrb[10].mxu0 %v4874_v46 }
 0x4ce   : > { %v3202_v53 = vpop.f32.mrb[4].mxu0  ;;  %v3240_v54 = vpop.f32.mrb[0].mxu1 }
 0x4cf   : > { %v1121_v55 = vpop.f32.mrb[5].mxu0  ;;  %v1226_v57 = vpop.f32.mrb[1].mxu1  ;;  %v1141_v60 = vmul.f32 0.088388346, %v3202_v53 }
 0x4d0   : > { %v1140_v58 = vmul.f32 0.088388346, %v1121_v55  ;;  %v3452_v59 = vpack.c.bf16 %v3240_v54, %v1226_v57 }
 0x4d2   : > { %3453 = vmatprep.subr.bf16.mxu0 %v3452_v59  ;;  %3286 = vmatprep.mubr.f32.mxu0 %v1140_v58 }
 0x4d3   : > { %3455 = vmatpush3.bf16.xpose.msra.mxu0 %v3452_v59 }
 0x4da   : > { %3287 = vmatmul.mubr.f32.vlgmr.msra.gmra.mrb[12].mxu0 %v1141_v60 }
 0x4db   : > { %2011 = vmatprep.mubr.f32.mxu0 %v4308_v5 }
 0x4dd   : > { %v3205_v61 = vpop.f32.mrb[6].mxu0  ;;  %v3243_v62 = vpop.f32.mrb[2].mxu1 }
 0x4de   : > { %v1131_v63 = vpop.f32.mrb[7].mxu0  ;;  %v1236_v0 = vpop.f32.mrb[3].mxu1  ;;  %v1143_v4 = vmul.f32 0.088388346, %v3205_v61 }
 0x4df   : > { %v1142_v1 = vmul.f32 0.088388346, %v1131_v63  ;;  %v3456_v2 = vpack.c.bf16 %v3243_v62, %v1236_v0  ;;  %v1710_v62 = vld [vmem:[#allocation14] sm:$0xff]  ;;  %v1711_v63 = vld [vmem:[#allocation14 + $0x8] sm:$0xff] }
 0x4e1   : > { %3457 = vmatprep.subr.bf16.mxu1 %v3456_v2  ;;  %3293 = vmatprep.mubr.f32.mxu1 %v1142_v1 }
 0x4e2   : > { %3459 = vmatpush3.bf16.xpose.msra.mxu1 %v3456_v2 }
 0x4e9   : > { %3294 = vmatmul.mubr.f32.vlgmr.msra.gmra.mrb[4].mxu1 %v1143_v4 }
 0x4ee   : > { %v3278_v6 = vpop.f32.mrb[8].mxu0 }
 0x4ef   : > { %v1327_v7 = vpop.f32.mrb[9].mxu0 }
 0x4f0   : > { %v3460_v19 = vpack.c.bf16 %v3278_v6, %v1327_v7  ;;  %v3468_v6 = vpack.c.bf16 %v1711_v63, %v1710_v62  ;;  %v1893_v62 = vld [vmem:[#allocation15 + $0x50] sm:$0xff] }
 0x4f2   : > { %v3281_v8 = vpop.f32.mrb[10].mxu0  ;;  %3461 = vmatprep.subr.bf16.mxu1 %v3460_v19 }
 0x4f3   : > { %v1337_v9 = vpop.f32.mrb[11].mxu0  ;;  %3463 = vmatpush3.bf16.msra.mxu1 %v3460_v19  ;;  %v1712_v19 = vld [vmem:[#allocation14 + $0x10] sm:$0xff] }
 0x4f4   : > { %v4883_v10 = vpack.c.bf16 %v3281_v8, %v1337_v9  ;;  %v1713_v8 = vld [vmem:[#allocation14 + $0x18] sm:$0xff] }
 0x4f6   : > { %3465 = vmatprep.subr.bf16.mxu1 %v4883_v10 }
 0x5ad   : > { %v3288_v15 = vpop.f32.mrb[12].mxu0 }
 0x5ae   : > { %v1420_v21 = vpop.f32.mrb[13].mxu0  ;;  %v1426_v24 = vadd.f32 %v3288_v15, %v1351_v20  ;;  %v1714_v20 = vld [vmem:[#allocation14 + $0x20] sm:$0xff]  ;;  %v1715_v15 = vld [vmem:[#allocation14 + $0x28] sm:$0xff] }
 0x5af   : > { %v1421_v22 = vadd.f32 %v1420_v21, %v1350_v13  ;;  %v3472_v13 = vpack.c.bf16 %v1713_v8, %v1712_v19  ;;  %v3476_v21 = vpack.c.bf16 %v1715_v15, %v1714_v20  ;;  %v1904_v20 = vld [vmem:[#allocation15 + $0xa8] sm:$0xff]  ;;  %v1902_v15 = vld [vmem:[#allocation15 + $0x98] sm:$0xff] }
 0x5b0   : > { %v1507_v25 = vsel %vm741_vm6, %v1426_v24, -inf }
 0x5b1   : > { %v1504_v16 = vsel %vm741_vm6, %v1421_v22, -inf }
 0x5b2   : > { %1505 = vmax.xlane.f32.xlu0 %v1504_v16  ;;  %v1718_v16 = vld [vmem:[#allocation14 + $0x40] sm:$0xff] }
 0x5b6   : > { %1508 = vmax.xlane.f32.xlu0 %v1507_v25  ;;  %v1719_v25 = vld [vmem:[#allocation14 + $0x48] sm:$0xff] }
 0x5b7   : > { %v3484_v26 = vpack.c.bf16 %v1719_v25, %v1718_v16 }
 0x5bc   : > { %v3295_v30 = vpop.f32.mrb[4].mxu1 }
 0x5bd   : > { %v1501_v28 = vadd.f32 %v3295_v30, %v1353_v29  ;;  %v1495_v31 = vpop.f32.mrb[5].mxu1  ;;  %v1721_v29 = vld [vmem:[#allocation14 + $0x58] sm:$0xff]  ;;  %v1722_v30 = vld [vmem:[#allocation14 + $0x60] sm:$0xff] }
 0x5be   : > { %v1496_v34 = vadd.f32 %v1495_v31, %v1352_v23  ;;  %v3488_v23 = vpack.c.bf16 %v1721_v29, %v1720_v27  ;;  %v1908_v29 = vld [vmem:[#allocation15 + $0xc8] sm:$0xff] }
 0x5bf   : > { %v1513_v36 = vsel %vm741_vm6, %v1501_v28, -inf }
 0x5c0   : > { %1514 = vmax.xlane.f32.xlu1 %v1513_v36  ;;  %v1510_v38 = vsel %vm741_vm6, %v1496_v34, -inf  ;;  %v1725_v36 = vld [vmem:[#allocation14 + $0x78] sm:$0xff] }
 0x5c1   : > { %1511 = vmax.xlane.f32.xlu0 %v1510_v38 }
 0x63f   : > { %v1506_v39 = vpop.xlane.xlu0 %1505 }
 0x640   : > { %v1516_v40 = vsub.f32 %v1421_v22, %v1506_v39  ;;  %v1716_v22 = vld [vmem:[#allocation14 + $0x30] sm:$0xff] }
 0x642   : > { %v1520_v35 = vmul.f32 1.442695, %v1516_v40 }
 0x643   : > { %v1509_v42 = vpop.xlane.xlu0 %1508 }
 0x644   : > { %3854 = vpow2.f32 %v1520_v35  ;;  %v1517_v37 = vsub.f32 %v1426_v24, %v1509_v42  ;;  %v1717_v24 = vld [vmem:[#allocation14 + $0x38] sm:$0xff] }
 0x646   : > { %v1522_v43 = vmul.f32 1.442695, %v1517_v37  ;;  %v1884_v37 = vld [vmem:[#allocation15 + $0x8] sm:$0xff] }
 0x648   : > { %3856 = vpow2.f32 %v1522_v43  ;;  %v1888_v43 = vld [vmem:[#allocation15 + $0x28] sm:$0xff] }
 0x64d   : > { %v1515_v32 = vpop.xlane.xlu1 %1514 }
 0x64e   : > { %v3855_v44 = vpop.eup %3854  ;;  %v1519_v45 = vsub.f32 %v1501_v28, %v1515_v32  ;;  %v1512_v33 = vpop.xlane.xlu0 %1511  ;;  %v1723_v28 = vld [vmem:[#allocation14 + $0x68] sm:$0xff]  ;;  %v1886_v32 = vld [vmem:[#allocation15 + $0x18] sm:$0xff] }
 0x64f   : > { %v1518_v47 = vsub.f32 %v1496_v34, %v1512_v33  ;;  %v1528_v48 = vsel %vm741_vm6, %v3855_v44, 0.0  ;;  %v3492_v31 = vpack.c.bf16 %v1723_v28, %v1722_v30  ;;  %v1724_v34 = vld [vmem:[#allocation14 + $0x70] sm:$0xff]  ;;  %v1883_v33 = vld [vmem:[#allocation15] sm:$0xff]  ;;  %v1910_v30 = vld [vmem:[#allocation15 + $0xd8] sm:$0xff] }
 0x650   : > { %v1526_v49 = vmul.f32 1.442695, %v1519_v45  ;;  %1529 = vadd.xlane.f32.xlu0 %v1528_v48  ;;  %v3496_v38 = vpack.c.bf16 %v1725_v36, %v1724_v34  ;;  %v1890_v45 = vld [vmem:[#allocation15 + $0x38] sm:$0xff]  ;;  %v1907_v34 = vld [vmem:[#allocation15 + $0xc0] sm:$0xff] }
 0x651   : > { %v1524_v50 = vmul.f32 1.442695, %v1518_v47  ;;  %v1887_v47 = vld [vmem:[#allocation15 + $0x20] sm:$0xff]  ;;  %v3532_v48 = vpack.c.bf16 %v1890_v45, %v1886_v32  ;;  %v1918_v32 = vld [vmem:[#allocation15 + $0x118] sm:$0xff] }
 0x652   : > { %v3857_v51 = vpop.eup %3856  ;;  %3858 = vpow2.f32 %v1526_v49  ;;  %v3502_v49 = vpack.c.bf16 %v1887_v47, %v1883_v33  ;;  %v1911_v36 = vld [vmem:[#allocation15 + $0xe0] sm:$0xff]  ;;  %v1922_v45 = vld [vmem:[#allocation15 + $0x138] sm:$0xff] }
 0x653   : > { %3860 = vpow2.f32 %v1524_v50  ;;  %v1531_v52 = vsel %vm741_vm6, %v3857_v51, 0.0  ;;  %v1885_v50 = vld [vmem:[#allocation15 + $0x10] sm:$0xff]  ;;  %v1915_v33 = vld [vmem:[#allocation15 + $0x100] sm:$0xff] }
 0x654   : > { %1532 = vadd.xlane.f32.xlu1 %v1531_v52  ;;  %v1892_v52 = vld [vmem:[#allocation15 + $0x48] sm:$0xff]  ;;  %v1919_v47 = vld [vmem:[#allocation15 + $0x120] sm:$0xff] }
 0x65c   : > { %v3859_v53 = vpop.eup %3858 }
 0x65d   : > { %v3861_v54 = vpop.eup %3860  ;;  %v1537_v55 = vsel %vm741_vm6, %v3859_v53, 0.0 }
 0x65e   : > { %1538 = vadd.xlane.f32.xlu1 %v1537_v55  ;;  %v1534_v57 = vsel %vm741_vm6, %v3861_v54, 0.0  ;;  %v1894_v55 = vld [vmem:[#allocation15 + $0x58] sm:$0xff] }
 0x65f   : > { %1535 = vadd.xlane.f32.xlu0 %v1534_v57  ;;  %v1898_v57 = vld [vmem:[#allocation15 + $0x78] sm:$0xff] }
 0x6dd   : > { %v1530_v58 = vpop.xlane.xlu0 %1529 }
 0x6de   : > { %3862 = vrcp.f32 %v1530_v58 }
 0x6e1   : > { %v1533_v59 = vpop.xlane.xlu1 %1532 }
 0x6e2   : > { %3864 = vrcp.f32 %v1533_v59  ;;  %v3536_v59 = vpack.c.bf16 %v1898_v57, %v1894_v55  ;;  %v1926_v55 = vld [vmem:[#allocation15 + $0x158] sm:$0xff] }
 0x6e8   : > { %v3863_v60 = vpop.eup %3862 }
 0x6e9   : > { %v1544_v61 = vmul.f32 %v3863_v60, %v3855_v44  ;;  %v3500_v44 = vpack.c.bf16 %v1888_v43, %v1884_v37  ;;  %v1891_v60 = vld [vmem:[#allocation15 + $0x40] sm:$0xff]  ;;  %v1916_v37 = vld [vmem:[#allocation15 + $0x108] sm:$0xff] }
 0x6ea   : > { %v1920_v43 = vld [vmem:[#allocation15 + $0x128] sm:$0xff] }
 0x6eb   : > { %v1539_v0 = vpop.xlane.xlu1 %1538  ;;  %3300 = vmatprep.mubr.msk.f32.mxu1 %vm741_vm6, %v1544_v61  ;;  %3501 = vmatprep.subr.bf16.mxu0 %v3500_v44  ;;  %v1895_v61 = vld [vmem:[#allocation15 + $0x60] sm:$0xff]  ;;  %v3516_v44 = vpack.c.bf16 %v1920_v43, %v1916_v37 }
 0x6ec   : > { %v3865_v1 = vpop.eup %3864  ;;  %3866 = vrcp.f32 %v1539_v0  ;;  %v1536_v2 = vpop.xlane.xlu0 %1535  ;;  %3503 = vmatpush1.bf16.msra.mxu0 %v3502_v49  ;;  %v3506_v63 = vpack.c.bf16 %v1895_v61, %v1891_v60  ;;  %v1897_v0 = vld [vmem:[#allocation15 + $0x70] sm:$0xff]  ;;  %v3518_v49 = vpack.c.bf16 %v1919_v47, %v1915_v33  ;;  %v1927_v60 = vld [vmem:[#allocation15 + $0x160] sm:$0xff] }
 0x6ed   : > { %v1545_v4 = vmul.f32 %v3865_v1, %v3857_v51  ;;  %3868 = vrcp.f32 %v1536_v2  ;;  %v1889_v51 = vld [vmem:[#allocation15 + $0x30] sm:$0xff]  ;;  %v3538_v1 = vpack.c.bf16 %v1897_v0, %v1893_v62 }
 0x6ee   : > { %v1929_v0 = vld [vmem:[#allocation15 + $0x170] sm:$0xff] }
 0x6ef   : > { %3301 = vmatmul.mubr.msk.f32.vlgmr.msra.gmra.mrb[6].mxu1 %vm741_vm6, %v1545_v4 }
 0x6f0   : > { %3467 = vmatpush3.bf16.msra.mxu1 %v4883_v10  ;;  %v3480_v10 = vpack.c.bf16 %v1717_v24, %v1716_v22  ;;  %v1906_v22 = vld [vmem:[#allocation15 + $0xb8] sm:$0xff]  ;;  %v1899_v24 = vld [vmem:[#allocation15 + $0x80] sm:$0xff] }
 0x6f1   : > { %3469 = vmatprep.subr.bf16.mxu1 %v3468_v6  ;;  %v3540_v16 = vpack.c.bf16 %v1906_v22, %v1902_v15  ;;  %v1933_v15 = vld [vmem:[#allocation15 + $0x190] sm:$0xff] }
 0x6f6   : > { %v3867_v7 = vpop.eup %3866 }
 0x6f7   : > { %v3869_v9 = vpop.eup %3868  ;;  %v1547_v12 = vmul.f32 %v3867_v7, %v3859_v53  ;;  %v3534_v53 = vpack.c.bf16 %v1889_v51, %v1885_v50  ;;  %v1917_v50 = vld [vmem:[#allocation15 + $0x110] sm:$0xff] }
 0x6f8   : > { %v1546_v11 = vmul.f32 %v3869_v9, %v3861_v54  ;;  %v1896_v54 = vld [vmem:[#allocation15 + $0x68] sm:$0xff]  ;;  %v1921_v51 = vld [vmem:[#allocation15 + $0x130] sm:$0xff] }
 0x6f9   : > { %v3504_v58 = vpack.c.bf16 %v1896_v54, %v1892_v52  ;;  %v3550_v52 = vpack.c.bf16 %v1921_v51, %v1917_v50  ;;  %v1928_v54 = vld [vmem:[#allocation15 + $0x168] sm:$0xff] }
 0x6fa   : > { %3307 = vmatprep.mubr.msk.f32.mxu1 %vm741_vm6, %v1546_v11 }
 0x6fb   : > { %3308 = vmatmul.mubr.msk.f32.vlgmr.msra.gmra.mrb[8].mxu1 %vm741_vm6, %v1547_v12  ;;  %3505 = vmatprep.subr.bf16.mxu0 %v3504_v58  ;;  %v1930_v58 = vld [vmem:[#allocation15 + $0x178] sm:$0xff] }
 0x6fc   : > { %3471 = vmatpush3.bf16.msra.mxu1 %v3468_v6  ;;  %3507 = vmatpush1.bf16.msra.mxu0 %v3506_v63  ;;  %v3552_v61 = vpack.c.bf16 %v1930_v58, %v1926_v55  ;;  %v1925_v63 = vld [vmem:[#allocation15 + $0x150] sm:$0xff] }
 0x6fd   : > { %3473 = vmatprep.subr.bf16.mxu1 %v3472_v13 }
 0x700   : > { %3475 = vmatpush3.bf16.msra.mxu1 %v3472_v13  ;;  %v1900_v13 = vld [vmem:[#allocation15 + $0x88] sm:$0xff] }
 0x701   : > { %3477 = vmatprep.subr.bf16.mxu1 %v3476_v21 }
 0x704   : > { %3479 = vmatpush3.bf16.msra.mxu1 %v3476_v21  ;;  %v3508_v21 = vpack.c.bf16 %v1904_v20, %v1900_v13 }
 0x705   : > { %3481 = vmatprep.subr.bf16.mxu1 %v3480_v10 }
 0x706   : > { %3509 = vmatprep.subr.bf16.mxu0 %v3508_v21  ;;  %v1937_v21 = vld [vmem:[#allocation15 + $0x1b0] sm:$0xff] }
 0x707   : > { %v3558_v22 = vpack.c.bf16 %v1937_v21, %v1933_v15  ;;  %v2301_v15 = vld [vmem:[#allocation17 + $0x100] sm:$0xff]  ;;  %v2302_v21 = vld [vmem:[#allocation17 + $0x108] sm:$0xff] }
 0x708   : > { %3483 = vmatpush3.bf16.msra.mxu1 %v3480_v10  ;;  %v1903_v10 = vld [vmem:[#allocation15 + $0xa0] sm:$0xff] }
 0x709   : > { %3485 = vmatprep.subr.bf16.mxu1 %v3484_v26  ;;  %v3510_v25 = vpack.c.bf16 %v1903_v10, %v1899_v24  ;;  %v1940_v24 = vld [vmem:[#allocation15 + $0x1c8] sm:$0xff] }
 0x70a   : > { %v1944_v10 = vld [vmem:[#allocation15 + $0x1e8] sm:$0xff] }
 0x70b   : > { %3511 = vmatpush1.bf16.msra.mxu0 %v3510_v25  ;;  %v3528_v25 = vpack.c.bf16 %v1944_v10, %v1940_v24 }
 0x70c   : > { %3487 = vmatpush3.bf16.msra.mxu1 %v3484_v26  ;;  %v1905_v26 = vld [vmem:[#allocation15 + $0xb0] sm:$0xff] }
 0x70d   : > { %3489 = vmatprep.subr.bf16.mxu1 %v3488_v23 }
 0x710   : > { %3491 = vmatpush3.bf16.msra.mxu1 %v3488_v23  ;;  %v1912_v23 = vld [vmem:[#allocation15 + $0xe8] sm:$0xff] }
 0x711   : > { %3493 = vmatprep.subr.bf16.mxu1 %v3492_v31  ;;  %v3512_v28 = vpack.c.bf16 %v1912_v23, %v1908_v29  ;;  %v1941_v23 = vld [vmem:[#allocation15 + $0x1d0] sm:$0xff] }
 0x713   : > { %3513 = vmatprep.subr.bf16.mxu0 %v3512_v28 }
 0x714   : > { %3495 = vmatpush3.bf16.msra.mxu1 %v3492_v31  ;;  %v1914_v31 = vld [vmem:[#allocation15 + $0xf8] sm:$0xff] }
 0x715   : > { %3497 = vmatprep.subr.bf16.mxu1 %v3496_v38 }
 0x718   : > { %3499 = vmatpush3.bf16.msra.mxu1 %v3496_v38  ;;  %v3544_v38 = vpack.c.bf16 %v1914_v31, %v1910_v30  ;;  %v1945_v30 = vld [vmem:[#allocation15 + $0x1f0] sm:$0xff]  ;;  %v2285_v31 = vld [vmem:[#allocation17 + $0x80] sm:$0xff] }
 0x719   : > { %3533 = vmatprep.subr.bf16.mxu1 %v3532_v48  ;;  %v3548_v48 = vpack.c.bf16 %v1922_v45, %v1918_v32  ;;  %v3562_v28 = vpack.c.bf16 %v1945_v30, %v1941_v23 }
 0x7c2   : > { %v3302_v39 = vpop.f32.mrb[6].mxu1 }
 0x7c3   : > { %v1620_v40 = vpop.f32.mrb[7].mxu1 }
 0x7c4   : > { %3342 = vmatprep.mubr.f32.mxu1 %v1620_v40  ;;  %v1909_v40 = vld [vmem:[#allocation15 + $0xd0] sm:$0xff] }
 0x7c5   : > { %3343 = vmatmul.mubr.f32.vlgmr.msra.gmra.mrb[10].mxu1 %v3302_v39  ;;  %v3514_v39 = vpack.c.bf16 %v1911_v36, %v1907_v34  ;;  %v2286_v34 = vld [vmem:[#allocation17 + $0x88] sm:$0xff]  ;;  %v2317_v36 = vld [vmem:[#allocation17 + $0x180] sm:$0xff] }
 0x7c6   : > { %3535 = vmatpush1.bf16.msra.mxu1 %v3534_v53  ;;  %v1924_v53 = vld [vmem:[#allocation15 + $0x148] sm:$0xff] }
 0x7c7   : > { %3537 = vmatprep.subr.bf16.mxu1 %v3536_v59  ;;  %3515 = vmatpush1.bf16.msra.mxu0 %v3514_v39  ;;  %v3520_v57 = vpack.c.bf16 %v1928_v54, %v1924_v53  ;;  %v1923_v59 = vld [vmem:[#allocation15 + $0x140] sm:$0xff]  ;;  %v2318_v39 = vld [vmem:[#allocation17 + $0x188] sm:$0xff] }
 0x7c8   : > { %3517 = vmatprep.subr.bf16.mxu0 %v3516_v44  ;;  %v3522_v62 = vpack.c.bf16 %v1927_v60, %v1923_v59 }
 0x7ca   : > { %3539 = vmatpush1.bf16.msra.mxu1 %v3538_v1  ;;  %v3554_v1 = vpack.c.bf16 %v1929_v0, %v1925_v63 }
 0x7cb   : > { %3541 = vmatprep.subr.bf16.mxu1 %v3540_v16  ;;  %3519 = vmatpush1.bf16.msra.mxu0 %v3518_v49  ;;  %v1942_v16 = vld [vmem:[#allocation15 + $0x1d8] sm:$0xff] }
 0x7cc   : > { %3521 = vmatprep.subr.bf16.mxu0 %v3520_v57  ;;  %v1869_v57 = vsub.s32 1, %v4783_v14 }
 0x7ce   : > { %v3309_v35 = vpop.f32.mrb[8].mxu1 }
 0x7cf   : > { %v1701_v42 = vpop.f32.mrb[9].mxu1  ;;  %3523 = vmatpush1.bf16.msra.mxu0 %v3522_v62 }
 0x7d0   : > { %3345 = vmatprep.mubr.f32.mxu1 %v1701_v42 }
 0x7d1   : > { %3346 = vmatmul.mubr.f32.gmra.mrb[12].mxu1 %v3309_v35  ;;  %v1913_v35 = vld [vmem:[#allocation15 + $0xf0] sm:$0xff] }
 0x7d2   : > { %2100 = vmatprep.mubr.f32.mxu1 %v4308_v5  ;;  %v3546_v42 = vpack.c.bf16 %v1913_v35, %v1909_v40  ;;  %v3596_v40 = vpack.c.bf16 %v2318_v39, %v2317_v36  ;;  %v2288_v36 = vld [vmem:[#allocation17 + $0x98] sm:$0xff] }
 0x898   : > { %v3344_v2 = vpop.f32.mrb[10].mxu1 }
 0x899   : > { %v1792_v4 = vpop.f32.mrb[11].mxu1  ;;  %v4908_v7 = vadd.f32 %v3344_v2, %v4862_v18  ;;  %v1932_v2 = vld [vmem:[#allocation15 + $0x188] sm:$0xff] }
 0x89a   : > { %v4905_v6 = vadd.f32 %v1792_v4, %v4860_v17  ;;  %v1936_v4 = vld [vmem:[#allocation15 + $0x1a8] sm:$0xff] }
 0x89b   : > { %v1828_v8 = vmul.f32 %v4908_v7, %v4908_v7 }
 0x89c   : > { %1815 = vadd.xlane.f32.xlu0 %v4905_v6  ;;  %v1827_v19 = vmul.f32 %v4905_v6, %v4905_v6 }
 0x89e   : > { %1831 = vadd.xlane.f32.xlu1 %v1827_v19  ;;  %v1934_v19 = vld [vmem:[#allocation15 + $0x198] sm:$0xff] }
 0x8a0   : > { %1817 = vadd.xlane.f32.xlu0 %v4908_v7 }
 0x8a2   : > { %1833 = vadd.xlane.f32.xlu1 %v1828_v8  ;;  %v3524_v8 = vpack.c.bf16 %v1936_v4, %v1932_v2 }
 0x8a4   : > { %v3347_v9 = vpop.f32.mrb[12].mxu1  ;;  %3525 = vmatprep.subr.bf16.mxu0 %v3524_v8 }
 0x8a5   : > { %v1802_v11 = vpop.f32.mrb[13].mxu1  ;;  %v4920_v18 = vadd.f32 %v3347_v9, %v4874_v46  ;;  %v1938_v9 = vld [vmem:[#allocation15 + $0x1b8] sm:$0xff] }
 0x8a6   : > { %v4917_v17 = vadd.f32 %v1802_v11, %v4870_v41  ;;  %v1901_v41 = vld [vmem:[#allocation15 + $0x90] sm:$0xff]  ;;  %v1931_v11 = vld [vmem:[#allocation15 + $0x180] sm:$0xff]  ;;  %v3556_v13 = vpack.c.bf16 %v1938_v9, %v1934_v19 }
 0x8a7   : > { %v1830_v46 = vmul.f32 %v4920_v18, %v4920_v18  ;;  %v3542_v27 = vpack.c.bf16 %v1905_v26, %v1901_v41  ;;  %v1946_v41 = vld [vmem:[#allocation15 + $0x1f8] sm:$0xff]  ;;  %v1939_v26 = vld [vmem:[#allocation15 + $0x1c0] sm:$0xff] }
 0x8a8   : > { %1819 = vadd.xlane.f32.xlu0 %v4917_v17  ;;  %v1829_v12 = vmul.f32 %v4917_v17, %v4917_v17 }
 0x8a9   : > { %3543 = vmatpush1.bf16.msra.mxu1 %v3542_v27  ;;  %v3560_v27 = vpack.c.bf16 %v1946_v41, %v1942_v16  ;;  %v3598_v41 = vpack.c.bf16 %v2302_v21, %v2301_v15  ;;  %v2277_v15 = vld [vmem:[#allocation17 + $0x40] sm:$0xff]  ;;  %v2278_v21 = vld [vmem:[#allocation17 + $0x48] sm:$0xff] }
 0x8aa   : > { %1835 = vadd.xlane.f32.xlu1 %v1829_v12  ;;  %3545 = vmatprep.subr.bf16.mxu1 %v3544_v38  ;;  %v1935_v12 = vld [vmem:[#allocation15 + $0x1a0] sm:$0xff]  ;;  %v3564_v38 = vpack.c.bf16 %v2286_v34, %v2285_v31 }
 0x8ab   : > { %v3526_v20 = vpack.c.bf16 %v1935_v12, %v1931_v11  ;;  %v1878_v11 = vrot.slane %v4856_v3, %v1869_v57  ;;  %v2269_v12 = vld [vmem:[#allocation17] sm:$0xff] }
 0x8ac   : > { %1821 = vadd.xlane.f32.xlu0 %v4920_v18 }
 0x8ad   : > { %3547 = vmatpush1.bf16.msra.mxu1 %v3546_v42  ;;  %3527 = vmatpush1.bf16.msra.mxu0 %v3526_v20  ;;  %v2270_v20 = vld [vmem:[#allocation17 + $0x8] sm:$0xff] }
 0x8ae   : > { %1837 = vadd.xlane.f32.xlu1 %v1830_v46  ;;  %3549 = vmatprep.subr.bf16.mxu1 %v3548_v48  ;;  %v1943_v46 = vld [vmem:[#allocation15 + $0x1e0] sm:$0xff] }
 0x8af   : > { %v3530_v29 = vpack.c.bf16 %v1943_v46, %v1939_v26  ;;  %3529 = vmatprep.subr.bf16.mxu0 %v3528_v25  ;;  %v3566_v25 = vpack.c.bf16 %v2270_v20, %v2269_v12  ;;  %v2325_v12 = vld [vmem:[#allocation17 + $0x1c0] sm:$0xff]  ;;  %v2326_v20 = vld [vmem:[#allocation17 + $0x1c8] sm:$0xff] }
 0x8b1   : > { %3551 = vmatpush1.bf16.msra.mxu1 %v3550_v52  ;;  %3531 = vmatpush1.bf16.msra.mxu0 %v3530_v29 }
 0x8b2   : > { %3553 = vmatprep.subr.bf16.mxu1 %v3552_v61  ;;  %3565 = vmatprep.subr.bf16.mxu0 %v3564_v38  ;;  %v2319_v38 = vld [vmem:[#allocation17 + $0x190] sm:$0xff] }
 0x8b5   : > { %3555 = vmatpush1.bf16.msra.mxu1 %v3554_v1  ;;  %v1870_v1 = vrot.slane %v4847_v56, %v1869_v57 }
 0x8b6   : > { %3557 = vmatprep.subr.bf16.mxu1 %v3556_v13 }
 0x8b9   : > { %3559 = vmatpush1.bf16.msra.mxu1 %v3558_v22 }
 0x8ba   : > { %3561 = vmatprep.subr.bf16.mxu1 %v3560_v27 }
 0x8bd   : > { %3563 = vmatpush1.bf16.msra.mxu1 %v3562_v28 }
 0x8be   : > { %3597 = vmatprep.subr.bf16.mxu1 %v3596_v40  ;;  %v2320_v40 = vld [vmem:[#allocation17 + $0x198] sm:$0xff] }
 0x929   : > { %v1816_v35 = vpop.xlane.xlu0 %1815 }
 0x92a   : > { %v1823_v42 = vmul.f32 0.0078125, %v1816_v35  ;;  %v2271_v35 = vld [vmem:[#allocation17 + $0x10] sm:$0xff] }
 0x92b   : > { %v1832_v37 = vpop.xlane.xlu1 %1831 }
 0x92c   : > { %v1843_v43 = vmul.f32 %v1823_v42, %v1823_v42  ;;  %v1839_v32 = vmul.f32 0.0078125, %v1832_v37  ;;  %v1851_v63 = vsub.f32 %v4905_v6, %v1823_v42  ;;  %v2272_v42 = vld [vmem:[#allocation17 + $0x18] sm:$0xff]  ;;  %v3600_v37 = vpack.c.bf16 %v2320_v40, %v2319_v38  ;;  %v2298_v38 = vld [vmem:[#allocation17 + $0xe8] sm:$0xff] }
 0x92d   : > { %v1818_v44 = vpop.xlane.xlu0 %1817 }
 0x92e   : > { %v1847_v45 = vsub.f32 %v1839_v32, %v1843_v43  ;;  %v1824_v33 = vmul.f32 0.0078125, %v1818_v44  ;;  %v3570_v43 = vpack.c.bf16 %v2272_v42, %v2271_v35  ;;  %v2303_v32 = vld [vmem:[#allocation17 + $0x110] sm:$0xff]  ;;  %v2304_v44 = vld [vmem:[#allocation17 + $0x118] sm:$0xff]  ;;  %v2330_v35 = vld [vmem:[#allocation17 + $0x1e8] sm:$0xff] }
 0x92f   : > { %v1834_v47 = vpop.xlane.xlu1 %1833  ;;  %v2281_v42 = vld [vmem:[#allocation17 + $0x60] sm:$0xff] }
 0x930   : > { %v1855_v48 = vadd.f32 1e-05, %v1847_v45  ;;  %v1844_v49 = vmul.f32 %v1824_v33, %v1824_v33  ;;  %v1840_v50 = vmul.f32 0.0078125, %v1834_v47  ;;  %v1852_v22 = vsub.f32 %v4908_v7, %v1824_v33  ;;  %v2290_v33 = vld [vmem:[#allocation17 + $0xa8] sm:$0xff]  ;;  %v2321_v47 = vld [vmem:[#allocation17 + $0x1a0] sm:$0xff] }
 0x931   : > { %v3602_v45 = vpack.c.bf16 %v2304_v44, %v2303_v32  ;;  %v2313_v44 = vld [vmem:[#allocation17 + $0x160] sm:$0xff] }
 0x932   : > { %3870 = vrsqrt.f32 %v1855_v48  ;;  %v1848_v51 = vsub.f32 %v1840_v50, %v1844_v49  ;;  %v2322_v49 = vld [vmem:[#allocation17 + $0x1a8] sm:$0xff]  ;;  %v2273_v50 = vld [vmem:[#allocation17 + $0x20] sm:$0xff] }
 0x934   : > { %v1856_v52 = vadd.f32 1e-05, %v1848_v51  ;;  %v2274_v51 = vld [vmem:[#allocation17 + $0x28] sm:$0xff] }
 0x935   : > { %v1820_v53 = vpop.xlane.xlu0 %1819 }
 0x936   : > { %3872 = vrsqrt.f32 %v1856_v52  ;;  %v1825_v54 = vmul.f32 0.0078125, %v1820_v53  ;;  %v3604_v52 = vpack.c.bf16 %v2322_v49, %v2321_v47  ;;  %v3574_v53 = vpack.c.bf16 %v2274_v51, %v2273_v50  ;;  %v2300_v47 = vld [vmem:[#allocation17 + $0xf8] sm:$0xff]  ;;  %v2283_v51 = vld [vmem:[#allocation17 + $0x70] sm:$0xff] }
 0x937   : > { %v1836_v55 = vpop.xlane.xlu1 %1835  ;;  %v2332_v50 = vld [vmem:[#allocation17 + $0x1f8] sm:$0xff] }
 0x938   : > { %v1845_v58 = vmul.f32 %v1825_v54, %v1825_v54  ;;  %v1841_v59 = vmul.f32 0.0078125, %v1836_v55  ;;  %v1853_v7 = vsub.f32 %v4917_v17, %v1825_v54  ;;  %v2305_v54 = vld [vmem:[#allocation17 + $0x120] sm:$0xff]  ;;  %v2306_v55 = vld [vmem:[#allocation17 + $0x128] sm:$0xff] }
 0x939   : > { %v1822_v60 = vpop.xlane.xlu0 %1821  ;;  %v3606_v57 = vpack.c.bf16 %v2306_v55, %v2305_v54  ;;  %v2315_v55 = vld [vmem:[#allocation17 + $0x170] sm:$0xff] }
 0x93a   : > { %v1849_v61 = vsub.f32 %v1841_v59, %v1845_v58  ;;  %v1826_v62 = vmul.f32 0.0078125, %v1822_v60  ;;  %v2291_v58 = vld [vmem:[#allocation17 + $0xb0] sm:$0xff]  ;;  %v2292_v59 = vld [vmem:[#allocation17 + $0xb8] sm:$0xff] }
 0x93b   : > { %v1838_v0 = vpop.xlane.xlu1 %1837  ;;  %v2323_v60 = vld [vmem:[#allocation17 + $0x1b0] sm:$0xff] }
 0x93c   : > { %v3871_v2 = vpop.eup %3870  ;;  %v1857_v4 = vadd.f32 1e-05, %v1849_v61  ;;  %v1846_v19 = vmul.f32 %v1826_v62, %v1826_v62  ;;  %v1842_v8 = vmul.f32 0.0078125, %v1838_v0  ;;  %v1854_v29 = vsub.f32 %v4920_v18, %v1826_v62  ;;  %v2287_v18 = vld [vmem:[#allocation17 + $0x90] sm:$0xff]  ;;  %v2324_v62 = vld [vmem:[#allocation17 + $0x1b8] sm:$0xff] }
 0x93d   : > { %v1863_v9 = vmul.f32 %v3871_v2, %v1851_v63  ;;  %v3568_v39 = vpack.c.bf16 %v2288_v36, %v2287_v18  ;;  %v3576_v61 = vpack.c.bf16 %v2292_v59, %v2291_v58  ;;  %v2275_v63 = vld [vmem:[#allocation17 + $0x30] sm:$0xff]  ;;  %v2276_v0 = vld [vmem:[#allocation17 + $0x38] sm:$0xff]  ;;  %v2297_v36 = vld [vmem:[#allocation17 + $0xe0] sm:$0xff] }
 0x93e   : > { %3874 = vrsqrt.f32 %v1857_v4  ;;  %v1850_v13 = vsub.f32 %v1842_v8, %v1846_v19  ;;  %v3578_v2 = vpack.c.bf16 %v2276_v0, %v2275_v63  ;;  %v2307_v4 = vld [vmem:[#allocation17 + $0x130] sm:$0xff]  ;;  %v2308_v19 = vld [vmem:[#allocation17 + $0x138] sm:$0xff]  ;;  %v3588_v40 = vpack.c.bf16 %v2298_v38, %v2297_v36 }
 0x93f   : > { %v1871_v24 = vmul.f32 %v1870_v1, %v1863_v9  ;;  %v3610_v8 = vpack.c.bf16 %v2308_v19, %v2307_v4  ;;  %v2293_v9 = vld [vmem:[#allocation17 + $0xc0] sm:$0xff] }
 0x940   : > { %v3873_v6 = vpop.eup %3872  ;;  %v1858_v10 = vadd.f32 1e-05, %v1850_v13 }
 0x941   : > { %v4933_v16 = vadd.f32 %v1878_v11, %v1871_v24  ;;  %v1864_v56 = vmul.f32 %v3873_v6, %v1852_v22  ;;  %v3612_v22 = vpack.c.bf16 %v2326_v20, %v2325_v12  ;;  %v3582_v24 = vpack.c.bf16 %v2278_v21, %v2277_v15  ;;  %v2309_v6 = vld [vmem:[#allocation17 + $0x140] sm:$0xff] }
 0x942   : > { %3876 = vrsqrt.f32 %v1858_v10  ;;  %v2310_v10 = vld [vmem:[#allocation17 + $0x148] sm:$0xff] }
 0x943   : > { %2012 = vmatmul.mubr.f32.vlgmr.msra.gmra.mrb[14].mxu0 %v4933_v16  ;;  %2101 = vmatmul.mubr.f32.vlgmr.msra.gmra.mrb[14].mxu1 %v4933_v16  ;;  %v1872_v3 = vmul.f32 %v1870_v1, %v1864_v56  ;;  %v3614_v56 = vpack.c.bf16 %v2310_v10, %v2309_v6 }
 0x944   : > { %2017 = vmatprep.mubr.f32.mxu0 %v4308_v5  ;;  %2106 = vmatprep.mubr.f32.mxu1 %v4308_v5 }
 0x945   : > { %v4939_v26 = vadd.f32 %v1878_v11, %v1872_v3  ;;  %3567 = vmatpush3.bf16.msra.mxu0 %v3566_v25  ;;  %3599 = vmatpush3.bf16.msra.mxu1 %v3598_v41  ;;  %v2295_v25 = vld [vmem:[#allocation17 + $0xd0] sm:$0xff]  ;;  %v2296_v41 = vld [vmem:[#allocation17 + $0xd8] sm:$0xff] }
 0x946   : > { %3569 = vmatprep.subr.bf16.mxu0 %v3568_v39  ;;  %3601 = vmatprep.subr.bf16.mxu1 %v3600_v37  ;;  %v2327_v3 = vld [vmem:[#allocation17 + $0x1d0] sm:$0xff]  ;;  %v2329_v39 = vld [vmem:[#allocation17 + $0x1e0] sm:$0xff]  ;;  %v2282_v37 = vld [vmem:[#allocation17 + $0x68] sm:$0xff] }
 0x947   : > { %2018 = vmatmul.mubr.f32.gmra.mrb[16].mxu0 %v4939_v26  ;;  %2107 = vmatmul.mubr.f32.gmra.mrb[16].mxu1 %v4939_v26  ;;  %v3590_v32 = vpack.c.bf16 %v2282_v37, %v2281_v42 }
 0x948   : > { %v3875_v46 = vpop.eup %3874  ;;  %2023 = vmatprep.mubr.f32.mxu0 %v4308_v5  ;;  %2112 = vmatprep.mubr.f32.mxu1 %v4308_v5 }
 0x949   : > { %v1865_v27 = vmul.f32 %v3875_v46, %v1853_v7  ;;  %3571 = vmatpush3.bf16.msra.mxu0 %v3570_v43  ;;  %3603 = vmatpush3.bf16.msra.mxu1 %v3602_v45  ;;  %v3584_v7 = vpack.c.bf16 %v2296_v41, %v2295_v25  ;;  %v2328_v46 = vld [vmem:[#allocation17 + $0x1d8] sm:$0xff]  ;;  %v3620_v43 = vpack.c.bf16 %v2330_v35, %v2329_v39  ;;  %v2314_v45 = vld [vmem:[#allocation17 + $0x168] sm:$0xff] }
 0x94a   : > { %3605 = vmatprep.subr.bf16.mxu1 %v3604_v52  ;;  %v2284_v52 = vld [vmem:[#allocation17 + $0x78] sm:$0xff] }
 0x94b   : > { %v1873_v23 = vmul.f32 %v1870_v1, %v1865_v27  ;;  %v2279_v27 = vld [vmem:[#allocation17 + $0x50] sm:$0xff]  ;;  %v3594_v54 = vpack.c.bf16 %v2284_v52, %v2283_v51 }
 0x94c   : > { %v3877_v30 = vpop.eup %3876 }
 0x94d   : > { %v4947_v28 = vadd.f32 %v1878_v11, %v1873_v23  ;;  %v1866_v31 = vmul.f32 %v3877_v30, %v1854_v29  ;;  %3607 = vmatpush3.bf16.msra.mxu1 %v3606_v57  ;;  %v2280_v29 = vld [vmem:[#allocation17 + $0x58] sm:$0xff]  ;;  %v3616_v23 = vpack.c.bf16 %v2328_v46, %v2327_v3 }
 0x94e   : > { %v3586_v30 = vpack.c.bf16 %v2280_v29, %v2279_v27  ;;  %v2316_v57 = vld [vmem:[#allocation17 + $0x178] sm:$0xff] }
 0x94f   : > { %2024 = vmatmul.mubr.f32.gmra.mrb[18].mxu0 %v4947_v28  ;;  %2113 = vmatmul.mubr.f32.gmra.mrb[18].mxu1 %v4947_v28  ;;  %v1874_v17 = vmul.f32 %v1870_v1, %v1866_v31  ;;  %v3608_v1 = vpack.c.bf16 %v2324_v62, %v2323_v60  ;;  %v2311_v31 = vld [vmem:[#allocation17 + $0x150] sm:$0xff]  ;;  %v3626_v58 = vpack.c.bf16 %v2316_v57, %v2315_v55 }
 0x950   : > { %2029 = vmatprep.mubr.f32.mxu0 %v4308_v5  ;;  %2118 = vmatprep.mubr.f32.mxu1 %v4308_v5  ;;  %v2289_v5 = vld [vmem:[#allocation17 + $0xa0] sm:$0xff] }
 0x951   : > { %v4953_v34 = vadd.f32 %v1878_v11, %v1874_v17  ;;  %v3572_v48 = vpack.c.bf16 %v2290_v33, %v2289_v5  ;;  %3609 = vmatprep.subr.bf16.mxu1 %v3608_v1  ;;  %v2294_v11 = vld [vmem:[#allocation17 + $0xc8] sm:$0xff]  ;;  %v2312_v17 = vld [vmem:[#allocation17 + $0x158] sm:$0xff]  ;;  %v3622_v5 = vpack.c.bf16 %v2314_v45, %v2313_v44  ;;  %v2299_v33 = vld [vmem:[#allocation17 + $0xf0] sm:$0xff] }
 0x952   : > { %3611 = vmatpush3.bf16.msra.mxu1 %v3610_v8  ;;  %v3580_v13 = vpack.c.bf16 %v2294_v11, %v2293_v9  ;;  %v3618_v18 = vpack.c.bf16 %v2312_v17, %v2311_v31  ;;  %v3592_v49 = vpack.c.bf16 %v2300_v47, %v2299_v33 }
 0x953   : > { %2030 = vmatmul.mubr.f32.gmra.mrb[20].mxu0 %v4953_v34  ;;  %2119 = vmatmul.mubr.f32.gmra.mrb[20].mxu1 %v4953_v34 }
 0x954   : > { %3573 = vmatprep.subr.bf16.mxu0 %v3572_v48  ;;  %3613 = vmatprep.subr.bf16.mxu1 %v3612_v22  ;;  %v2331_v48 = vld [vmem:[#allocation17 + $0x1f0] sm:$0xff] }
 0x955   : > { %3575 = vmatpush3.bf16.msra.mxu0 %v3574_v53  ;;  %v3624_v53 = vpack.c.bf16 %v2332_v50, %v2331_v48 }
 0x956   : > { %3577 = vmatprep.subr.bf16.mxu0 %v3576_v61  ;;  %3615 = vmatpush3.bf16.msra.mxu1 %v3614_v56 }
 0x957   : > { %3617 = vmatprep.subr.bf16.mxu1 %v3616_v23 }
 0x959   : > { %3579 = vmatpush3.bf16.msra.mxu0 %v3578_v2 }
 0x95a   : > { %3581 = vmatprep.subr.bf16.mxu0 %v3580_v13  ;;  %3619 = vmatpush3.bf16.msra.mxu1 %v3618_v18 }
 0x95b   : > { %3621 = vmatprep.subr.bf16.mxu1 %v3620_v43 }
 0x95d   : > { %3583 = vmatpush3.bf16.msra.mxu0 %v3582_v24 }
 0x95e   : > { %3585 = vmatprep.subr.bf16.mxu0 %v3584_v7  ;;  %3623 = vmatpush3.bf16.msra.mxu1 %v3622_v5 }
 0x95f   : > { %3625 = vmatprep.subr.bf16.mxu1 %v3624_v53 }
 0x961   : > { %3587 = vmatpush3.bf16.msra.mxu0 %v3586_v30 }
 0x962   : > { %3589 = vmatprep.subr.bf16.mxu0 %v3588_v40  ;;  %3627 = vmatpush3.bf16.msra.mxu1 %v3626_v58 }
 0x965   : > { %3591 = vmatpush3.bf16.msra.mxu0 %v3590_v32 }
 0x966   : > { %3593 = vmatprep.subr.bf16.mxu0 %v3592_v49 }
 0x969   : > { %3595 = vmatpush3.bf16.msra.mxu0 %v3594_v54 }
 0xa16   : > { %v4957_v59 = vpop.f32.mrb[14].mxu0  ;;  %v4959_v60 = vpop.f32.mrb[14].mxu1 }
 0xa17   : > { %v2125_v61 = vmul.f32 %v4957_v59, %v4957_v59  ;;  %v2127_v62 = vmul.f32 %v4959_v60, %v4959_v60  ;;  %v4965_v63 = vpop.f32.mrb[15].mxu0  ;;  %v4967_v0 = vpop.f32.mrb[15].mxu1 }
 0xa18   : > { %v2126_v1 = vmul.f32 %v4965_v63, %v4965_v63  ;;  %v2128_v2 = vmul.f32 %v4967_v0, %v4967_v0 }
 0xa19   : > { %v2141_v4 = vmul.f32 %v2125_v61, %v4957_v59  ;;  %v2143_v19 = vmul.f32 %v2127_v62, %v4959_v60 }
 0xa1a   : > { %v2142_v8 = vmul.f32 %v2126_v1, %v4965_v63  ;;  %v2144_v9 = vmul.f32 %v2128_v2, %v4967_v0  ;;  %v4977_v11 = vpop.f32.mrb[16].mxu0  ;;  %v4979_v12 = vpop.f32.mrb[16].mxu1 }
 0xa1b   : > { %v2157_v13 = vmul.f32 0.044715, %v2141_v4  ;;  %v2159_v20 = vmul.f32 0.044715, %v2143_v19  ;;  %v2129_v15 = vmul.f32 %v4977_v11, %v4977_v11  ;;  %v2131_v21 = vmul.f32 %v4979_v12, %v4979_v12  ;;  %v4985_v22 = vpop.f32.mrb[17].mxu0  ;;  %v4987_v24 = vpop.f32.mrb[17].mxu1 }
 0xa1c   : > { %v2158_v6 = vmul.f32 0.044715, %v2142_v8  ;;  %v2160_v10 = vmul.f32 0.044715, %v2144_v9  ;;  %v2130_v56 = vmul.f32 %v4985_v22, %v4985_v22  ;;  %v2132_v25 = vmul.f32 %v4987_v24, %v4987_v24 }
 0xa1d   : > { %v2173_v41 = vadd.f32 %v2157_v13, %v4957_v59  ;;  %v2175_v3 = vadd.f32 %v2159_v20, %v4959_v60  ;;  %v2145_v7 = vmul.f32 %v2129_v15, %v4977_v11  ;;  %v2147_v46 = vmul.f32 %v2131_v21, %v4979_v12 }
 0xa1e   : > { %v2174_v27 = vadd.f32 %v2158_v6, %v4965_v63  ;;  %v2176_v29 = vadd.f32 %v2160_v10, %v4967_v0  ;;  %v2146_v23 = vmul.f32 %v2130_v56, %v4985_v22  ;;  %v2148_v30 = vmul.f32 %v2132_v25, %v4987_v24 }
 0xa1f   : > { %v2189_v31 = vmul.f32 0.7978846, %v2173_v41  ;;  %v2191_v17 = vmul.f32 0.7978846, %v2175_v3  ;;  %v2161_v18 = vmul.f32 0.044715, %v2145_v7 }
 0xa20   : > { %v2190_v36 = vmul.f32 0.7978846, %v2174_v27  ;;  %v2192_v38 = vmul.f32 0.7978846, %v2176_v29  ;;  %v2163_v39 = vmul.f32 0.044715, %v2147_v46 }
 0xa21   : > { %3878 = vtanh.f32 %v2189_v31  ;;  %v2177_v40 = vadd.f32 %v2161_v18, %v4977_v11  ;;  %v2162_v35 = vmul.f32 0.044715, %v2146_v23  ;;  %v2164_v42 = vmul.f32 0.044715, %v2148_v30 }
 0xa22   : > { %3880 = vtanh.f32 %v2191_v17  ;;  %v2179_v37 = vadd.f32 %v2163_v39, %v4979_v12  ;;  %v5003_v43 = vpop.f32.mrb[18].mxu0  ;;  %v5005_v32 = vpop.f32.mrb[18].mxu1 }
 0xa23   : > { %3882 = vtanh.f32 %v2190_v36  ;;  %v2193_v44 = vmul.f32 0.7978846, %v2177_v40  ;;  %v2178_v45 = vadd.f32 %v2162_v35, %v4985_v22  ;;  %v2180_v5 = vadd.f32 %v2164_v42, %v4987_v24  ;;  %v5009_v33 = vpop.f32.mrb[19].mxu0  ;;  %v5011_v47 = vpop.f32.mrb[19].mxu1 }
 0xa24   : > { %3884 = vtanh.f32 %v2192_v38  ;;  %v2195_v48 = vmul.f32 0.7978846, %v2179_v37  ;;  %v2133_v49 = vmul.f32 %v5003_v43, %v5003_v43  ;;  %v2135_v50 = vmul.f32 %v5005_v32, %v5005_v32 }
 0xa25   : > { %3886 = vtanh.f32 %v2193_v44  ;;  %v2194_v51 = vmul.f32 0.7978846, %v2178_v45  ;;  %v2196_v52 = vmul.f32 0.7978846, %v2180_v5  ;;  %v2134_v53 = vmul.f32 %v5009_v33, %v5009_v33 }
 0xa26   : > { %3888 = vtanh.f32 %v2195_v48  ;;  %v2149_v54 = vmul.f32 %v2133_v49, %v5003_v43  ;;  %v2151_v55 = vmul.f32 %v2135_v50, %v5005_v32  ;;  %v2136_v57 = vmul.f32 %v5011_v47, %v5011_v47  ;;  %v5023_v58 = vpop.f32.mrb[20].mxu0  ;;  %v5025_v61 = vpop.f32.mrb[20].mxu1 }
 0xa27   : > { %3890 = vtanh.f32 %v2194_v51  ;;  %v2150_v62 = vmul.f32 %v2134_v53, %v5009_v33  ;;  %v2137_v1 = vmul.f32 %v5023_v58, %v5023_v58  ;;  %v2139_v2 = vmul.f32 %v5025_v61, %v5025_v61  ;;  %v5032_v4 = vpop.f32.mrb[21].mxu0  ;;  %v5034_v19 = vpop.f32.mrb[21].mxu1 }
 0xa28   : > { %3892 = vtanh.f32 %v2196_v52  ;;  %v2165_v8 = vmul.f32 0.044715, %v2149_v54  ;;  %v2167_v9 = vmul.f32 0.044715, %v2151_v55  ;;  %v2152_v13 = vmul.f32 %v2136_v57, %v5011_v47 }
 0xa29   : > { %v2166_v20 = vmul.f32 0.044715, %v2150_v62  ;;  %v2153_v15 = vmul.f32 %v2137_v1, %v5023_v58  ;;  %v2155_v21 = vmul.f32 %v2139_v2, %v5025_v61  ;;  %v2138_v6 = vmul.f32 %v5032_v4, %v5032_v4 }
 0xa2a   : > { %v2181_v10 = vadd.f32 %v2165_v8, %v5003_v43  ;;  %v2183_v56 = vadd.f32 %v2167_v9, %v5005_v32  ;;  %v2168_v25 = vmul.f32 0.044715, %v2152_v13  ;;  %v2140_v41 = vmul.f32 %v5034_v19, %v5034_v19 }
 0xa2b   : > { %v3879_v3 = vpop.eup %3878  ;;  %v2182_v7 = vadd.f32 %v2166_v20, %v5009_v33  ;;  %v2169_v46 = vmul.f32 0.044715, %v2153_v15  ;;  %v2171_v27 = vmul.f32 0.044715, %v2155_v21  ;;  %v2154_v29 = vmul.f32 %v2138_v6, %v5032_v4 }
 0xa2c   : > { %v3881_v23 = vpop.eup %3880  ;;  %v2221_v30 = vadd.f32 1.0, %v3879_v3  ;;  %v2197_v31 = vmul.f32 0.7978846, %v2181_v10  ;;  %v2199_v17 = vmul.f32 0.7978846, %v2183_v56  ;;  %v2184_v18 = vadd.f32 %v2168_v25, %v5011_v47 }
 0xa2d   : > { %v3883_v36 = vpop.eup %3882  ;;  %v2223_v38 = vadd.f32 1.0, %v3881_v23  ;;  %v2198_v39 = vmul.f32 0.7978846, %v2182_v7  ;;  %v2185_v40 = vadd.f32 %v2169_v46, %v5023_v58  ;;  %v2187_v35 = vadd.f32 %v2171_v27, %v5025_v61 }
 0xa2e   : > { %v3885_v42 = vpop.eup %3884  ;;  %v2237_v37 = vmul.f32 0.5, %v2221_v30  ;;  %3894 = vtanh.f32 %v2197_v31  ;;  %v2200_v44 = vmul.f32 0.7978846, %v2184_v18  ;;  %v2170_v45 = vmul.f32 0.044715, %v2154_v29 }
 0xa2f   : > { %v3887_v5 = vpop.eup %3886  ;;  %3896 = vtanh.f32 %v2199_v17  ;;  %v2201_v48 = vmul.f32 0.7978846, %v2185_v40  ;;  %v2203_v49 = vmul.f32 0.7978846, %v2187_v35  ;;  %v2239_v51 = vmul.f32 0.5, %v2223_v38 }
 0xa30   : > { %v3889_v50 = vpop.eup %3888  ;;  %3898 = vtanh.f32 %v2198_v39  ;;  %v2186_v52 = vadd.f32 %v2170_v45, %v5032_v4  ;;  %v2156_v53 = vmul.f32 %v2140_v41, %v5034_v19  ;;  %v2253_v55 = vmul.f32 %v2237_v37, %v4957_v59 }
 0xa31   : > { %v3891_v54 = vpop.eup %3890  ;;  %3900 = vtanh.f32 %v2200_v44  ;;  %v2222_v57 = vadd.f32 1.0, %v3883_v36  ;;  %v2224_v62 = vadd.f32 1.0, %v3885_v42  ;;  %v2225_v10 = vadd.f32 1.0, %v3887_v5 }
 0xa32   : > { %v3893_v1 = vpop.eup %3892  ;;  %3902 = vtanh.f32 %v2201_v48  ;;  %v2202_v2 = vmul.f32 0.7978846, %v2186_v52  ;;  %v2172_v8 = vmul.f32 0.044715, %v2156_v53  ;;  %v2226_v9 = vadd.f32 1.0, %v3891_v54 }
 0xa33   : > { %3904 = vtanh.f32 %v2203_v49  ;;  %v2238_v13 = vmul.f32 0.5, %v2222_v57  ;;  %v2240_v20 = vmul.f32 0.5, %v2224_v62  ;;  %v2228_v15 = vadd.f32 1.0, %v3893_v1 }
 0xa34   : > { %3906 = vtanh.f32 %v2202_v2  ;;  %v2188_v21 = vadd.f32 %v2172_v8, %v5034_v19  ;;  %v2242_v6 = vmul.f32 0.5, %v2226_v9  ;;  %v2227_v41 = vadd.f32 1.0, %v3889_v50 }
 0xa35   : > { %v2254_v56 = vmul.f32 %v2238_v13, %v4965_v63  ;;  %v2256_v59 = vmul.f32 %v2240_v20, %v4967_v0  ;;  %v2244_v25 = vmul.f32 0.5, %v2228_v15  ;;  %v2255_v3 = vmul.f32 %v2239_v51, %v4959_v60 }
 0xa36   : > { %v2204_v7 = vmul.f32 0.7978846, %v2188_v21  ;;  %v2258_v46 = vmul.f32 %v2242_v6, %v4985_v22  ;;  %v2241_v27 = vmul.f32 0.5, %v2225_v10  ;;  %v2243_v23 = vmul.f32 0.5, %v2227_v41 }
 0xa37   : > { %2397 = vmatprep.mubr.f32.mxu0 %v2254_v56  ;;  %2482 = vmatprep.mubr.f32.mxu1 %v2256_v59  ;;  %v2260_v29 = vmul.f32 %v2244_v25, %v4987_v24 }
 0xa38   : > { %v3895_v30 = vpop.eup %3894  ;;  %3908 = vtanh.f32 %v2204_v7  ;;  %2398 = vmatmul.mubr.f32.vlgmr.msra.gmra.mrb[22].mxu0 %v2253_v55  ;;  %2483 = vmatmul.mubr.f32.vlgmr.msra.gmra.mrb[22].mxu1 %v2255_v3  ;;  %v2257_v60 = vmul.f32 %v2241_v27, %v4977_v11  ;;  %v2259_v17 = vmul.f32 %v2243_v23, %v4979_v12 }
 0xa39   : > { %v3897_v63 = vpop.eup %3896  ;;  %2402 = vmatprep.mubr.f32.mxu0 %v2258_v46  ;;  %2487 = vmatprep.mubr.f32.mxu1 %v2260_v29  ;;  %v2229_v0 = vadd.f32 1.0, %v3895_v30 }
 0xa3a   : > { %v3899_v31 = vpop.eup %3898  ;;  %v2231_v22 = vadd.f32 1.0, %v3897_v63 }
 0xa3b   : > { %v3901_v18 = vpop.eup %3900  ;;  %v2230_v36 = vadd.f32 1.0, %v3899_v31  ;;  %v2245_v39 = vmul.f32 0.5, %v2229_v0 }
 0xa3c   : > { %v3903_v38 = vpop.eup %3902  ;;  %2403 = vmatmul.mubr.f32.gmra.mrb[24].mxu0 %v2257_v60  ;;  %2488 = vmatmul.mubr.f32.gmra.mrb[24].mxu1 %v2259_v17  ;;  %v2232_v24 = vadd.f32 1.0, %v3901_v18  ;;  %v2247_v42 = vmul.f32 0.5, %v2231_v22 }
 0xa3d   : > { %v3905_v40 = vpop.eup %3904  ;;  %v2246_v35 = vmul.f32 0.5, %v2230_v36  ;;  %v2233_v37 = vadd.f32 1.0, %v3903_v38  ;;  %v2261_v12 = vmul.f32 %v2245_v39, %v5003_v43 }
 0xa3e   : > { %v3907_v44 = vpop.eup %3906  ;;  %v2248_v45 = vmul.f32 0.5, %v2232_v24  ;;  %v2235_v50 = vadd.f32 1.0, %v3905_v40  ;;  %v2263_v51 = vmul.f32 %v2247_v42, %v5005_v32 }
 0xa3f   : > { %v2262_v5 = vmul.f32 %v2246_v35, %v5009_v33  ;;  %v2234_v48 = vadd.f32 1.0, %v3907_v44  ;;  %v2249_v49 = vmul.f32 0.5, %v2233_v37 }
 0xa40   : > { %v2264_v11 = vmul.f32 %v2248_v45, %v5011_v47  ;;  %v2251_v57 = vmul.f32 0.5, %v2235_v50 }
 0xa41   : > { %2407 = vmatprep.mubr.f32.mxu0 %v2262_v5  ;;  %v2250_v52 = vmul.f32 0.5, %v2234_v48  ;;  %v2265_v33 = vmul.f32 %v2249_v49, %v5023_v58 }
 0xa42   : > { %v3909_v53 = vpop.eup %3908  ;;  %2492 = vmatprep.mubr.f32.mxu1 %v2264_v11  ;;  %2408 = vmatmul.mubr.f32.gmra.mrb[26].mxu0 %v2261_v12  ;;  %v2267_v62 = vmul.f32 %v2251_v57, %v5025_v61  ;;  %v3918_v57 = vld [vmem:[%s5270_s4] sm:$0x7] }
 0xa43   : > { %2493 = vmatmul.mubr.f32.gmra.mrb[26].mxu1 %v2263_v51  ;;  %v2266_v54 = vmul.f32 %v2250_v52, %v5032_v4  ;;  %v2236_v55 = vadd.f32 1.0, %v3909_v53  ;;  %v2561_v51 = vsub.s32 2, %v4783_v14 }
 0xa45   : > { %2412 = vmatprep.mubr.f32.mxu0 %v2266_v54  ;;  %v2252_v47 = vmul.f32 0.5, %v2236_v55 }
 0xa46   : > { %2413 = vmatmul.mubr.f32.gmra.mrb[28].mxu0 %v2265_v33 }
 0xa47   : > { %v2268_v43 = vmul.f32 %v2252_v47, %v5034_v19  ;;  %v2562_v47 = vrot.slane %v3918_v57, %v2561_v51 }
 0xa49   : > { %2497 = vmatprep.mubr.f32.mxu1 %v2268_v43 }
 0xa4a   : > { %2498 = vmatmul.mubr.f32.gmra.mrb[28].mxu1 %v2267_v62 }
 0xb0b   : > { %v3098_v32 = vpop.f32.mrb[22].mxu0  ;;  %v3142_v1 = vpop.f32.mrb[22].mxu1 }
 0xb0c   : > { %v3099_v2 = vpop.f32.mrb[23].mxu0  ;;  %v3143_v8 = vpop.f32.mrb[23].mxu1 }
 0xb0d   : > { %v3100_v9 = vadd.f32 %v3099_v2, %v3098_v32  ;;  %v3144_v13 = vadd.f32 %v3143_v8, %v3142_v1  ;;  %v3919_v1 = vld [vmem:[%s5271_s25] sm:$0x7] }
 0xb0e   : > { %v2570_v2 = vrot.slane %v3919_v1, %v2561_v51 }
 0xb0f   : > { %v2485_v4 = vadd.f32 %v3144_v13, %v3100_v9  ;;  %v3101_v20 = vpop.f32.mrb[24].mxu0  ;;  %v3145_v15 = vpop.f32.mrb[24].mxu1 }
 0xb10   : > { %v3102_v58 = vpop.f32.mrb[25].mxu0  ;;  %v3146_v21 = vpop.f32.mrb[25].mxu1 }
 0xb11   : > { %v3103_v6 = vadd.f32 %v3102_v58, %v3101_v20  ;;  %v3147_v10 = vadd.f32 %v3146_v21, %v3145_v15  ;;  %v5070_v56 = vadd.f32 %v2485_v4, %v4933_v16 }
 0xb13   : > { %v2490_v19 = vadd.f32 %v3147_v10, %v3103_v6  ;;  %2507 = vadd.xlane.f32.xlu0 %v5070_v56  ;;  %v2519_v25 = vmul.f32 %v5070_v56, %v5070_v56 }
 0xb15   : > { %v3104_v61 = vpop.f32.mrb[26].mxu0  ;;  %v5074_v59 = vadd.f32 %v2490_v19, %v4939_v26 }
 0xb16   : > { %v3148_v41 = vpop.f32.mrb[26].mxu1  ;;  %v3105_v3 = vpop.f32.mrb[27].mxu0 }
 0xb17   : > { %2509 = vadd.xlane.f32.xlu1 %v5074_v59  ;;  %2523 = vadd.xlane.f32.xlu0 %v2519_v25  ;;  %v3106_v7 = vadd.f32 %v3105_v3, %v3104_v61  ;;  %v3149_v46 = vpop.f32.mrb[27].mxu1  ;;  %v2520_v16 = vmul.f32 %v5074_v59, %v5074_v59 }
 0xb18   : > { %v3150_v27 = vadd.f32 %v3149_v46, %v3148_v41 }
 0xb19   : > { %v3107_v29 = vpop.f32.mrb[28].mxu0 }
 0xb1a   : > { %v2495_v23 = vadd.f32 %v3150_v27, %v3106_v7  ;;  %v3108_v30 = vpop.f32.mrb[29].mxu0 }
 0xb1b   : > { %2525 = vadd.xlane.f32.xlu1 %v2520_v16  ;;  %v3109_v26 = vadd.f32 %v3108_v30, %v3107_v29 }
 0xb1c   : > { %v5082_v63 = vadd.f32 %v2495_v23, %v4947_v28 }
 0xb1d   : > { %v3151_v0 = vpop.f32.mrb[28].mxu1 }
 0xb1e   : > { %v3152_v31 = vpop.f32.mrb[29].mxu1  ;;  %2511 = vadd.xlane.f32.xlu0 %v5082_v63  ;;  %v2521_v17 = vmul.f32 %v5082_v63, %v5082_v63 }
 0xb1f   : > { %v3153_v60 = vadd.f32 %v3152_v31, %v3151_v0 }
 0xb21   : > { %v2500_v22 = vadd.f32 %v3153_v60, %v3109_v26 }
 0xb22   : > { %2527 = vadd.xlane.f32.xlu0 %v2521_v17 }
 0xb23   : > { %v2506_v18 = vadd.f32 %v2500_v22, %v4953_v34 }
 0xb25   : > { %2513 = vadd.xlane.f32.xlu1 %v2506_v18  ;;  %v2522_v36 = vmul.f32 %v2506_v18, %v2506_v18 }
 0xb29   : > { %2529 = vadd.xlane.f32.xlu1 %v2522_v36 }
 0xba0   : > { %v2508_v38 = vpop.xlane.xlu0 %2507 }
 0xba1   : > { %v2515_v24 = vmul.f32 0.0078125, %v2508_v38 }
 0xba3   : > { %v2535_v40 = vmul.f32 %v2515_v24, %v2515_v24  ;;  %v2543_v43 = vsub.f32 %v5070_v56, %v2515_v24 }
 0xba4   : > { %v2510_v39 = vpop.xlane.xlu1 %2509  ;;  %v2524_v28 = vpop.xlane.xlu0 %2523 }
 0xba5   : > { %v2516_v35 = vmul.f32 0.0078125, %v2510_v39  ;;  %v2531_v42 = vmul.f32 0.0078125, %v2524_v28 }
 0xba7   : > { %v2539_v37 = vsub.f32 %v2531_v42, %v2535_v40  ;;  %v2536_v45 = vmul.f32 %v2516_v35, %v2516_v35  ;;  %v2544_v4 = vsub.f32 %v5074_v59, %v2516_v35 }
 0xba8   : > { %v2526_v44 = vpop.xlane.xlu1 %2525 }
 0xba9   : > { %v2547_v5 = vadd.f32 1e-05, %v2539_v37  ;;  %v2532_v48 = vmul.f32 0.0078125, %v2526_v44 }
 0xbab   : > { %3910 = vrsqrt.f32 %v2547_v5  ;;  %v2540_v11 = vsub.f32 %v2532_v48, %v2536_v45  ;;  %v2512_v12 = vpop.xlane.xlu0 %2511 }
 0xbac   : > { %v2517_v49 = vmul.f32 0.0078125, %v2512_v12 }
 0xbad   : > { %v2548_v34 = vadd.f32 1e-05, %v2540_v11 }
 0xbae   : > { %v2537_v52 = vmul.f32 %v2517_v49, %v2517_v49  ;;  %v2545_v61 = vsub.f32 %v5082_v63, %v2517_v49 }
 0xbaf   : > { %3912 = vrsqrt.f32 %v2548_v34  ;;  %v2528_v50 = vpop.xlane.xlu0 %2527 }
 0xbb0   : > { %v2533_v53 = vmul.f32 0.0078125, %v2528_v50 }
 0xbb2   : > { %v2541_v54 = vsub.f32 %v2533_v53, %v2537_v52  ;;  %v2514_v55 = vpop.xlane.xlu1 %2513 }
 0xbb3   : > { %v2518_v33 = vmul.f32 0.0078125, %v2514_v55 }
 0xbb4   : > { %v2549_v62 = vadd.f32 1e-05, %v2541_v54 }
 0xbb5   : > { %v3911_v32 = vpop.eup %3910  ;;  %v2538_v9 = vmul.f32 %v2518_v33, %v2518_v33  ;;  %v2546_v46 = vsub.f32 %v2506_v18, %v2518_v33 }
 0xbb6   : > { %v2555_v14 = vmul.f32 %v3911_v32, %v2543_v43  ;;  %3914 = vrsqrt.f32 %v2549_v62  ;;  %v2530_v8 = vpop.xlane.xlu1 %2529 }
 0xbb7   : > { %v2534_v13 = vmul.f32 0.0078125, %v2530_v8 }
 0xbb8   : > { %v2563_v20 = vmul.f32 %v2562_v47, %v2555_v14 }
 0xbb9   : > { %v3913_v15 = vpop.eup %3912  ;;  %v2542_v58 = vsub.f32 %v2534_v13, %v2538_v9 }
 0xbba   : > { %v2571_v21 = vadd.f32 %v2570_v2, %v2563_v20  ;;  %v2556_v6 = vmul.f32 %v3913_v15, %v2544_v4 }
 0xbbb   : > { %v2550_v10 = vadd.f32 1e-05, %v2542_v58 }
 0xbbc   : > { %2575 = vst [vmem:[#allocation2] sm:$0xff] %v2571_v21  ;;  %v2564_v56 = vmul.f32 %v2562_v47, %v2556_v6 }
 0xbbd   : > { %3916 = vrsqrt.f32 %v2550_v10 }
 0xbbe   : > { %v2572_v19 = vadd.f32 %v2570_v2, %v2564_v56 }
 0xbc0   : > { %v3915_v25 = vpop.eup %3914  ;;  %2576 = vst [vmem:[#allocation2 + $0x8] sm:$0xff] %v2572_v19 }
 0xbc1   : > { %v2557_v41 = vmul.f32 %v3915_v25, %v2545_v61 }
 0xbc3   : > { %v2565_v3 = vmul.f32 %v2562_v47, %v2557_v41 }
 0xbc5   : > { %v2573_v7 = vadd.f32 %v2570_v2, %v2565_v3 }
 0xbc7   : > { %v3917_v27 = vpop.eup %3916  ;;  %2577 = vst [vmem:[#allocation2 + $0x10] sm:$0xff] %v2573_v7 }
 0xbc8   : > { %v2558_v59 = vmul.f32 %v3917_v27, %v2546_v46 }
 0xbca   : > { %v2566_v16 = vmul.f32 %v2562_v47, %v2558_v59 }
 0xbcc   : > { %v2574_v29 = vadd.f32 %v2570_v2, %v2566_v16 }
 0xbce   : > { %2578 = vst [vmem:[#allocation2 + $0x18] sm:$0xff] %v2574_v29 }
 0xbcf PF: > { %v2584_v23 = vld [vmem:[%s4749_s29 + $0x8] sm:$0xff]  ;;  %v2586_v30 = vld [vmem:[%s4749_s29 + $0x18] sm:$0xff]  ;;  %v2583_v26 = vld [vmem:[%s4749_s29] sm:$0xff]  ;;  %v4309_v17 = vmov 0.0   ;;  %v2617_v19 = vlaneseq  ;;  %s2961_s12 = sshll.u32 %s4415_s24, 8  ;;  %s2738_s14 = sshll.u32 %s4763_s17, 4  ;;  %s5150_s14 = int_to_ptr.vmem [resolvable:$true] %s2738_s14 }
 0xbd0   : > { %v3628_v63 = vpack.c.bf16 %v2586_v30, %v2584_v23  ;;  %v2585_v0 = vld [vmem:[%s4749_s29 + $0x10] sm:$0xff]  ;;  %v2588_v31 = vld [vmem:[%s4749_s29 + $0x28] sm:$0xff]  ;;  %v2590_v60 = vld [vmem:[%s4749_s29 + $0x38] sm:$0xff]  ;;  %2691 = vmatprep.mubr.f32.mxu0 %v4309_v17  ;;  %2703 = vmatprep.mubr.f32.mxu1 %v4309_v17  ;;  %s5273_s5 = sld [smem:[#allocation38_spill]]  ;;  %s4202_s2 = scalar_lea.vmem %s5150_s14, 1024 }
 0xbd1   : > { %v3630_v22 = vpack.c.bf16 %v2585_v0, %v2583_v26  ;;  %v3632_v18 = vpack.c.bf16 %v2590_v60, %v2588_v31  ;;  %v2587_v36 = vld [vmem:[%s4749_s29 + $0x20] sm:$0xff]  ;;  %v2589_v38 = vld [vmem:[%s4749_s29 + $0x30] sm:$0xff]  ;;  %v2592_v24 = vld [vmem:[%s4749_s29 + $0x48] sm:$0xff]  ;;  %v2618_v61 = vshrl.u32 %v2617_v19, 7  ;;  %p4203_p8 = scmp.ne.s32.totalorder %s5150_s14, %s4202_s2  ;;  %p5274_p9 = scmp.ne.s32.totalorder %s5250_s23, 0 }
 0xbd2   : > { %3629 = vmatprep.subr.bf16.mxu0 %v3628_v63  ;;  %3660 = vmatprep.subr.bf16.mxu1 %v3628_v63  ;;  %v2594_v39 = vld [vmem:[%s4749_s29 + $0x58] sm:$0xff]  ;;  %v3634_v28 = vpack.c.bf16 %v2589_v38, %v2587_v36  ;;  %v2591_v35 = vld [vmem:[%s4749_s29 + $0x40] sm:$0xff]  ;;  %v2593_v42 = vld [vmem:[%s4749_s29 + $0x50] sm:$0xff] }
 0xbd3   : > { %3631 = vmatpush1.bf16.msra.mxu0 %v3630_v22  ;;  %3668 = vmatpush1.bf16.msra.mxu1 %v3630_v22  ;;  %v3636_v40 = vpack.c.bf16 %v2594_v39, %v2592_v24  ;;  %v2596_v37 = vld [vmem:[%s4749_s29 + $0x68] sm:$0xff]  ;;  %v2598_v44 = vld [vmem:[%s4749_s29 + $0x78] sm:$0xff]  ;;  %v3638_v45 = vpack.c.bf16 %v2593_v42, %v2591_v35  ;;  %v2595_v48 = vld [vmem:[%s4749_s29 + $0x60] sm:$0xff]  ;;  %v2619_v25 = vsub.s32 0, %v2618_v61  ;;  %v2623_v3 = vsub.s32 1, %v2618_v61  ;;  %p4204_p4 = pnand %p4203_p8, %p5274_p9 }
 0xbd4   : > { %3633 = vmatprep.subr.bf16.mxu0 %v3632_v18  ;;  %3661 = vmatprep.subr.bf16.mxu1 %v3632_v18  ;;  %v3640_v5 = vpack.c.bf16 %v2598_v44, %v2596_v37  ;;  %v2597_v11 = vld [vmem:[%s4749_s29 + $0x70] sm:$0xff]  ;;  %v2600_v12 = vld [vmem:[%s4749_s29 + $0x88] sm:$0xff]  ;;  %v2602_v49 = vld [vmem:[%s4749_s29 + $0x98] sm:$0xff] }
 0xbd5   : > { %v3642_v34 = vpack.c.bf16 %v2597_v11, %v2595_v48  ;;  %v3644_v50 = vpack.c.bf16 %v2602_v49, %v2600_v12  ;;  %v2599_v51 = vld [vmem:[%s4749_s29 + $0x80] sm:$0xff]  ;;  %v2601_v52 = vld [vmem:[%s4749_s29 + $0x90] sm:$0xff]  ;;  %v2604_v53 = vld [vmem:[%s4749_s29 + $0xa8] sm:$0xff]  ;;  %p4205_p6 = pneg %p4204_p4 }
 0xbd6   : > { %v2606_v54 = vld [vmem:[%s4749_s29 + $0xb8] sm:$0xff]  ;;  %v3646_v55 = vpack.c.bf16 %v2601_v52, %v2599_v51  ;;  %v2603_v57 = vld [vmem:[%s4749_s29 + $0xa0] sm:$0xff]  ;;  %v2605_v47 = vld [vmem:[%s4749_s29 + $0xb0] sm:$0xff]  ;;  %s5148_s28 = scalar_lea.hbm %s5273_s5, %s2961_s12 }
 0xbd7   : > { %3635 = vmatpush1.bf16.msra.mxu0 %v3634_v28  ;;  %3669 = vmatpush1.bf16.msra.mxu1 %v3634_v28  ;;  %v3648_v33 = vpack.c.bf16 %v2606_v54, %v2604_v53  ;;  %v2608_v43 = vld [vmem:[%s4749_s29 + $0xc8] sm:$0xff]  ;;  %v2610_v62 = vld [vmem:[%s4749_s29 + $0xd8] sm:$0xff]  ;;  %v3650_v32 = vpack.c.bf16 %v2605_v47, %v2603_v57  ;;  %v2607_v2 = vld [vmem:[%s4749_s29 + $0xc0] sm:$0xff] }
 0xbd8   : > { %3637 = vmatprep.subr.bf16.mxu0 %v3636_v40  ;;  %3662 = vmatprep.subr.bf16.mxu1 %v3636_v40  ;;  %v3652_v1 = vpack.c.bf16 %v2610_v62, %v2608_v43  ;;  %v2609_v14 = vld [vmem:[%s4749_s29 + $0xd0] sm:$0xff]  ;;  %v2612_v8 = vld [vmem:[%s4749_s29 + $0xe8] sm:$0xff]  ;;  %v2614_v9 = vld [vmem:[%s4749_s29 + $0xf8] sm:$0xff] }
 0xbd9   : > { %v3654_v13 = vpack.c.bf16 %v2609_v14, %v2607_v2  ;;  %v3656_v4 = vpack.c.bf16 %v2614_v9, %v2612_v8  ;;  %v2611_v20 = vld [vmem:[%s4749_s29 + $0xe0] sm:$0xff]  ;;  %v2613_v15 = vld [vmem:[%s4749_s29 + $0xf0] sm:$0xff]  ;;  %v2615_v41 = vld [vmem:[%s662_s22] sm:$0x3]  ;;  %s4310_s29 = smov [#allocation20]  }
 0xbda   : > { %v3658_v58 = vpack.c.bf16 %v2613_v15, %v2611_v20  ;;  %v2579_v21 = vld [vmem:[#allocation2] sm:$0xff]  ;;  %v2581_v6 = vld [vmem:[#allocation2 + $0x10] sm:$0xff]  ;;  %v2580_v10 = vld [vmem:[#allocation2 + $0x8] sm:$0xff]  ;;  %v2620_v7 = vrot.slane %v2615_v41, %v2619_v25  ;;  %v2624_v46 = vrot.slane %v2615_v41, %v2623_v3  ;;  %s4206_s0 = sshll.u32 %s4310_s29, 4  ;;  %s4207_s0 = int_to_ptr.vmem [resolvable:$false] %s4206_s0 }
 0xbdb   : > { %3639 = vmatpush1.bf16.msra.mxu0 %v3638_v45  ;;  %3670 = vmatpush1.bf16.msra.mxu1 %v3638_v45  ;;  %v2582_v56 = vld [vmem:[#allocation2 + $0x18] sm:$0xff]  ;;  %s4208_s3 = scalar_lea.vmem %s4207_s0, 2048  ;;  %p4209_p7 = scmp.lt.s32.totalorder %s5150_s14, %s4207_s0 }
 0xbdc   : > { %3641 = vmatprep.subr.bf16.mxu0 %v3640_v5  ;;  %3663 = vmatprep.subr.bf16.mxu1 %v3640_v5  ;;  %p4210_p5 = scmp.lt.s32.totalorder %s4208_s3, %s4202_s2 }
 0xbde   : > { %p4211_p10 = por %p4210_p5, %p4209_p7 }
 0xbdf   : > { %3643 = vmatpush1.bf16.msra.mxu0 %v3642_v34  ;;  %3671 = vmatpush1.bf16.msra.mxu1 %v3642_v34 }
 0xbe0   : > { %3645 = vmatprep.subr.bf16.mxu0 %v3644_v50  ;;  %3664 = vmatprep.subr.bf16.mxu1 %v3644_v50  ;;  %p4212_p11 = pnand %p4211_p10, %p4205_p6 }
 0xbe3   : > { %3647 = vmatpush1.bf16.msra.mxu0 %v3646_v55  ;;  %3672 = vmatpush1.bf16.msra.mxu1 %v3646_v55 }
 0xbe4   : > { %3649 = vmatprep.subr.bf16.mxu0 %v3648_v33  ;;  %3665 = vmatprep.subr.bf16.mxu1 %v3648_v33 }
 0xbe7   : > { %3651 = vmatpush1.bf16.msra.mxu0 %v3650_v32  ;;  %3673 = vmatpush1.bf16.msra.mxu1 %v3650_v32 }
 0xbe8   : > { %3653 = vmatprep.subr.bf16.mxu0 %v3652_v1  ;;  %3666 = vmatprep.subr.bf16.mxu1 %v3652_v1 }
 0xbeb   : > { %3655 = vmatpush1.bf16.msra.mxu0 %v3654_v13  ;;  %3674 = vmatpush1.bf16.msra.mxu1 %v3654_v13 }
 0xbec   : > { %3657 = vmatprep.subr.bf16.mxu0 %v3656_v4  ;;  %3667 = vmatprep.subr.bf16.mxu1 %v3656_v4 }
 0xbef   : > { %3659 = vmatpush1.bf16.msra.mxu0 %v3658_v58  ;;  %3675 = vmatpush1.bf16.msra.mxu1 %v3658_v58 }
 0xbf2   : > { %2692 = vmatmul.mubr.f32.vlgmr.msra.gmra.mrb[0].mxu0 %v2579_v21  ;;  %2704 = vmatmul.mubr.f32.vlgmr.msra.gmra.mrb[0].mxu1 %v2581_v6 }
 0xbf3   : > { %2697 = vmatprep.mubr.f32.mxu0 %v4309_v17  ;;  %2709 = vmatprep.mubr.f32.mxu1 %v4309_v17 }
 0xbf6   : > { %2698 = vmatmul.mubr.f32.gmra.mrb[2].mxu0 %v2580_v10  ;;  %2710 = vmatmul.mubr.f32.gmra.mrb[2].mxu1 %v2582_v56 }
 0xcc5   : > { %v2693_v27 = vpop.f32.mrb[0].mxu0  ;;  %v2705_v59 = vpop.f32.mrb[0].mxu1 }
 0xcc6   : > { %v2694_v16 = vadd.f32 %v2693_v27, %v2620_v7  ;;  %v2706_v29 = vadd.f32 %v2705_v59, %v2620_v7  ;;  %v2695_v23 = vpop.f32.mrb[1].mxu0  ;;  %v2707_v30 = vpop.f32.mrb[1].mxu1 }
 0xcc7   : > { %v2696_v26 = vadd.f32 %v2695_v23, %v2624_v46  ;;  %v2708_v63 = vadd.f32 %v2707_v30, %v2624_v46 }
 0xcc8   : > { %2716 = vst [vmem:[%s4763_s17] sm:$0xff] %v2694_v16  ;;  %2720 = vst [vmem:[%s4763_s17 + $0x20] sm:$0xff] %v2706_v29 }
 0xcc9   : > { %2717 = vst [vmem:[%s4763_s17 + $0x8] sm:$0xff] %v2696_v26  ;;  %2721 = vst [vmem:[%s4763_s17 + $0x28] sm:$0xff] %v2708_v63  ;;  %v2699_v0 = vpop.f32.mrb[2].mxu0  ;;  %v2711_v31 = vpop.f32.mrb[2].mxu1 }
 0xcca   : > { %v2700_v60 = vadd.f32 %v2699_v0, %v2620_v7  ;;  %v2712_v17 = vadd.f32 %v2711_v31, %v2620_v7  ;;  %v2701_v22 = vpop.f32.mrb[3].mxu0  ;;  %v2713_v18 = vpop.f32.mrb[3].mxu1 }
 0xccb   : > { %v2702_v36 = vadd.f32 %v2701_v22, %v2624_v46  ;;  %v2714_v38 = vadd.f32 %v2713_v18, %v2624_v46 }
 0xccc   : > { %2718 = vst [vmem:[%s4763_s17 + $0x10] sm:$0xff] %v2700_v60  ;;  %2722 = vst [vmem:[%s4763_s17 + $0x30] sm:$0xff] %v2712_v17 }
 0xccd   : > { %2719 = vst [vmem:[%s4763_s17 + $0x18] sm:$0xff] %v2702_v36  ;;  %2723 = vst [vmem:[%s4763_s17 + $0x38] sm:$0xff] %v2714_v38 }
 0xcce   : > { %4215 = shalt.err (!%p4212_p11)
}
 0xccf   : > { %s4216_s17 = scalar_lea.hbm %s5148_s28, 1024  ;;  %s4220_s22 = scalar_lea.hbm %s5273_s5, 2048 }
 0xcd0   : > { %p4217_p3 = scmp.ne.s32.totalorder %s5148_s28, %s4216_s17  ;;  %p4221_p13 = scmp.lt.u32.totalorder %s5148_s28, %s5273_s5 }
 0xcd1   : > { %p4222_p0 = scmp.lt.u32.totalorder %s4220_s22, %s4216_s17  ;;  %p4224_p8 = scmp.lt.u32.totalorder %s4216_s17, %s5148_s28 }
 0xcd2   : > { %p4218_p12 = pnand %p4217_p3, %p5274_p9 }
 0xcd3   : > { %p4223_p2 = por %p4222_p0, %p4221_p13 }
 0xcd4   : > { %p4219_p1 = pneg %p4218_p12 }
 0xcd5   : > { %p4225_p4 = por %p4224_p8, %p4223_p2 }
 0xcd7   : > { %p4226_p6 = pnand %p4225_p4, %p4219_p1 }
 0xcd9   : > { %4229 = shalt.err (!%p4226_p6)
}
 0xcda   : > { %s4311_s2 = smov 256   ;;  %s4312_s3 = smov 512  }
 0xcdb   : > { %s4313_s24 = smov 16   ;;  %s5275_s12 = scalar_lea.sflag [#allocation5], %s4745_s1 }
 0xcdc   : > { %3714 = dma.vmem_to_hbm [thread:$0]  (%p5274_p9), %s5150_s14, 1024, %s5148_s28, %s5275_s12, %s4311_s2, %s4312_s3, %s4313_s24  }
 0xcdd PF: > { %s2753_s30 = sand.u32 1, %s4276_s18   ;;  %p5276_p7 = scmp.ne.s32.totalorder %s5251_s11, 0 }
 0xcde   : > { %p5277_p5 = scmp.ge.s32.totalorder %s4288_s21, 2  ;;  %s2754_s17 = scalar_lea.sflag [#allocation5], %s2753_s30 }
 0xce0   : > { %p3749_p10 = pnand %p5277_p5, %p5276_p7 }
 0xce2   : > { %4271 = dma.done.wait (!%p3749_p10), %s2754_s17, 1024  }
 0xce3   : > { %4273 = vsyncadd (!%p3749_p10), %s2754_s17, 4294966272  ;;  %p33_p11 = scmp.ge.s32.totalorder %s4650_s26, 4   ;;  %s5278_s18 = smov %s4280_s19 }
 0xce4   : > { %s5279_s19 = smov %s4284_s20  ;;  %s5280_s20 = smov %s4662_s15 }
 0xce5   : > { %s5281_s21 = smov %s4650_s26  ;;  %35 = sbr.rel (!%p33_p11) target bundleno = 21 (0x15), region = 169 }
 0xcec   :  { %2759 = vsyncpa [#allocation4], 1 }
 0xced   :  { %2761 = vsyncpa [#allocation4 + $0x1], 1 }
 0xcee   :  { %2762 = vsyncpa [#allocation7], 1 }
 0xcef   :  { %2763 = vsyncpa [#allocation10], 1 }
 0xcf0   :  { %2764 = vsyncpa [#allocation13], 1 }
 0xcf1   :  { %2765 = vsyncpa [#allocation16], 1 }
 0xcf2   :  { %2766 = vsyncpa [#allocation19], 1 }
 0xcf3   :  { %2768 = vsyncpa [#allocation19 + $0x1], 1 }
 0xcf4   :  { %2769 = vsyncpa [#allocation5], 1 }
 0xcf5   :  { %2771 = vsyncpa [#allocation5 + $0x1], 1 }

</bundles_post_ra>
